<compile_context>
chip_gen: v6e
topology: v6e:2x2x1
jax: 0.10.0
libtpu: 0.0.40
codegen_flags: <defaults>
</compile_context>

<pallas_src>
import math

import jax
import jax.numpy as jnp
from jax.experimental import pallas as pl
from jax.experimental.pallas import tpu as pltpu

K = 3          # TAGConv default number of hops
EPS = 1e-5     # BatchNorm eps
OUT_PAD = 128  # lane-dense padded output width (also the packed-vector lane width)


def _gelu(x):
    # exact (erf) GELU, matching torch.nn.GELU() default.
    # (tanh-approx GELU would route through the EUP and free VALU slots, but changes numerics.)
    return 0.5 * x * (1.0 + jax.lax.erf(x * (1.0 / math.sqrt(2.0))))


def node_glam_kernel(x_ref, apow_ref, vec_ref,
                     w1_ref, t1w_ref, w2_ref, t2w_ref,
                     w3x_ref, w3h_ref, w4_ref, out_ref):
    x = x_ref[...]                                   # f32 [N, F]

    f = x_ref.shape[1]
    h0 = w1_ref.shape[1]
    h1 = t1w_ref.shape[1]
    h2 = w2_ref.shape[1]
    h3 = t2w_ref.shape[1]
    h4 = w3x_ref.shape[1]

    # BatchNorm1d (training-mode batch statistics, biased variance), folded to a single
    # scale/shift FMA pass over [N, F].
    # TODO(synk): running_mean/running_var of torch BatchNorm1d are neither read nor updated.
    mean = jnp.mean(x, axis=0, keepdims=True)
    var = jnp.mean((x - mean) ** 2, axis=0, keepdims=True)
    scale = vec_ref[0:1, :f] * jax.lax.rsqrt(var + EPS)      # row 0: bn_gamma
    shift = vec_ref[1:2, :f] - mean * scale                  # row 1: bn_beta
    xn = x * scale + shift

    def tag_conv(h_in, w_stack, b):
        # TAGConv: sum_{k=0..K} (A^k h) @ W_k + b.
        # Hops use wrapper-precomputed A^k => K INDEPENDENT MXU pushes (no serial chain);
        # the (K+1) weight matmuls are ONE fused matmul over the lane-concatenated hop
        # stack [N, (K+1)*h] x [(K+1)*h, h_out].
        x0 = h_in.astype(jnp.bfloat16)
        hops = [x0]
        for k in range(K):
            hops.append(jnp.dot(apow_ref[k], x0,
                                preferred_element_type=jnp.float32).astype(jnp.bfloat16))
        hop_stack = jnp.concatenate(hops, axis=1)
        return jnp.dot(hop_stack, w_stack, preferred_element_type=jnp.float32) + b

    # linear1 + GELU
    h = _gelu(jnp.dot(xn.astype(jnp.bfloat16), w1_ref[...],
                      preferred_element_type=jnp.float32) + vec_ref[2:3, :h0])
    # tag1 + GELU
    h = _gelu(tag_conv(h, t1w_ref[...], vec_ref[3:4, :h1]))
    # linear2 + GELU
    h = _gelu(jnp.dot(h.astype(jnp.bfloat16), w2_ref[...],
                      preferred_element_type=jnp.float32) + vec_ref[4:5, :h2])
    # tag2 + GELU
    h = _gelu(tag_conv(h, t2w_ref[...], vec_ref[5:6, :h3]))

    # linear3 on cat([x, h], dim=1)  ==  x @ W3_x + h @ W3_h  (concat avoided, exact)
    a3 = _gelu(jnp.dot(x.astype(jnp.bfloat16), w3x_ref[...],
                       preferred_element_type=jnp.float32)
               + jnp.dot(h.astype(jnp.bfloat16), w3h_ref[...],
                         preferred_element_type=jnp.float32)
               + vec_ref[6:7, :h4])

    # linear4 -> lane-dense padded node embeddings [N, OUT_PAD]
    out_ref[...] = (jnp.dot(a3.astype(jnp.bfloat16), w4_ref[...],
                            preferred_element_type=jnp.float32)
                    + vec_ref[7:8, :]).astype(out_ref.dtype)


# ---------------------------- wrapper (plain JAX) ----------------------------

def _prepare_args(x, a_hat, params):
    """Wrapper-side layout plumbing: A powers, vector packing, bf16 casts, padding."""
    bf = lambda w: w.astype(jnp.bfloat16)
    f = x.shape[1]
    h0 = params["w1"].shape[1]
    h1 = params["t1w"].shape[-1]
    h2 = params["w2"].shape[1]
    h3 = params["t2w"].shape[-1]
    h4 = params["w3x"].shape[1]
    out_dim = params["w4"].shape[1]
    assert max(f, h0, h1, h2, h3, h4, out_dim) <= OUT_PAD, "packed-vector / output padding assumes <=128 lanes"

    # A, A^2, ..., A^K in f32 (graph constants), cast to bf16 once -> independent hop matmuls.
    a32 = a_hat.astype(jnp.float32)
    pows = [a32]
    for _ in range(K - 1):
        pows.append(pows[-1] @ a32)
    apow = bf(jnp.stack(pows, axis=0))                             # [K, N, N]

    # TAGConv weight stacks reshaped for the single fused contraction matmul.
    t1w = bf(params["t1w"].reshape(-1, h1))                        # [(K+1)*h0, h1]
    t2w = bf(params["t2w"].reshape(-1, h3))                        # [(K+1)*h2, h3]

    # linear4 padded to a lane-dense [h4, OUT_PAD] slab (unmasked vst in the kernel).
    w4p = jnp.zeros((h4, OUT_PAD), jnp.float32).at[:, :out_dim].set(params["w4"])

    # All tiny per-feature vectors packed into ONE (8, 128) f32 VMEM tile (1 DMA, not 8).
    vec = jnp.zeros((8, OUT_PAD), jnp.float32)
    rows = (params["bn_g"], params["bn_b"], params["b1"], params["t1b"],
            params["b2"], params["t2b"], params["b3"], params["b4"])
    for r, v in enumerate(rows):
        v = v.reshape(-1)
        vec = vec.at[r, :v.shape[0]].set(v)

    args = (x.astype(jnp.float32), apow, vec,
            bf(params["w1"]), t1w, bf(params["w2"]), t2w,
            bf(params["w3x"]), bf(params["w3h"]), bf(w4p))
    return args, out_dim


def _cost_estimate(n, f, hs, args):
    h0, h1, h2, h3, h4 = hs
    flops = 2 * n * (f * h0                      # linear1
                     + n * h0 * K                # tag1 hop matmuls (A^k @ x0)
                     + (K + 1) * h0 * h1         # tag1 fused weight matmul
                     + h1 * h2                   # linear2
                     + n * h2 * K                # tag2 hop matmuls
                     + (K + 1) * h2 * h3         # tag2 fused weight matmul
                     + (f + h3) * h4             # linear3 (split)
                     + h4 * OUT_PAD)             # linear4 (padded)
    transcendentals = n * (h0 + h1 + h2 + h3 + h4) + f   # erf GELUs + rsqrt
    bytes_accessed = sum(int(a.size) * a.dtype.itemsize for a in args)
    bytes_accessed += n * OUT_PAD * 4
    return pl.CostEstimate(flops=int(flops),
                           transcendentals=int(transcendentals),
                           bytes_accessed=int(bytes_accessed))


def node_glam_forward(x, a_hat, params):
    n, f = x.shape
    hs = (params["w1"].shape[1], params["t1w"].shape[-1],
          params["w2"].shape[1], params["t2w"].shape[-1],
          params["w3x"].shape[1])
    args, out_dim = _prepare_args(x, a_hat, params)
    vmem = pl.BlockSpec(memory_space=pltpu.MemorySpace.VMEM)
    out_padded = pl.pallas_call(
        node_glam_kernel,
        out_shape=jax.ShapeDtypeStruct((n, OUT_PAD), jnp.float32),
        in_specs=[vmem] * len(args),
        out_specs=vmem,
        cost_estimate=_cost_estimate(n, f, hs, args),
    )(*args)
    return out_padded[:, :out_dim]


# ---------------------------- init / graph glue ----------------------------

def _linear_init(key, fan_in, fan_out):
    kw, kb = jax.random.split(key)
    bound = 1.0 / math.sqrt(fan_in)
    w = jax.random.uniform(kw, (fan_in, fan_out), jnp.float32, -bound, bound)
    b = jax.random.uniform(kb, (1, fan_out), jnp.float32, -bound, bound)
    return w, b


def init_params(key, input_, h, output_):
    keys = jax.random.split(key, 6)
    p = {}
    # BatchNorm affine params (default init gamma=1, beta=0)
    p["bn_g"] = jnp.ones((1, input_), jnp.float32)
    p["bn_b"] = jnp.zeros((1, input_), jnp.float32)
    # linear1: input_ -> h[0]
    p["w1"], p["b1"] = _linear_init(keys[0], input_, h[0])
    # TAGConv1: (K+1) weight matrices h[0] -> h[1], zero bias (PyG default)
    bound = 1.0 / math.sqrt(h[0])
    p["t1w"] = jax.random.uniform(keys[1], (K + 1, h[0], h[1]), jnp.float32, -bound, bound)
    p["t1b"] = jnp.zeros((1, h[1]), jnp.float32)
    # linear2: h[1] -> h[2]
    p["w2"], p["b2"] = _linear_init(keys[2], h[1], h[2])
    # TAGConv2: (K+1) weight matrices h[2] -> h[3]
    bound = 1.0 / math.sqrt(h[2])
    p["t2w"] = jax.random.uniform(keys[3], (K + 1, h[2], h[3]), jnp.float32, -bound, bound)
    p["t2b"] = jnp.zeros((1, h[3]), jnp.float32)
    # linear3: (h[3] + input_) -> h[4], split into the x-part and the h-part (exact)
    fan_in3 = h[3] + input_
    kw, kb = jax.random.split(keys[4])
    bound = 1.0 / math.sqrt(fan_in3)
    w3 = jax.random.uniform(kw, (fan_in3, h[4]), jnp.float32, -bound, bound)
    p["w3x"] = w3[:input_]
    p["w3h"] = w3[input_:]
    p["b3"] = jax.random.uniform(kb, (1, h[4]), jnp.float32, -bound, bound)
    # linear4: h[4] -> output_
    p["w4"], p["b4"] = _linear_init(keys[5], h[4], output_)
    return p


def build_normalized_adjacency(edge_index, num_nodes):
    # Dense symmetric adjacency with GCN normalization (no added self-loops),
    # matching TAGConv's gcn_norm(normalize=True, add_self_loops=False).
    src, dst = edge_index[0], edge_index[1]
    a = jnp.zeros((num_nodes, num_nodes), jnp.float32)
    a = a.at[dst, src].set(1.0)
    a = jnp.maximum(a, a.T)  # symmetrize (also dedupes multi-edges)
    deg = a.sum(axis=1)
    d_inv_sqrt = jnp.where(deg > 0, 1.0 / jnp.sqrt(deg), 0.0)
    return d_inv_sqrt[:, None] * a * d_inv_sqrt[None, :]


if __name__ == "__main__":
    key = jax.random.PRNGKey(0)
    N, F = 64, 16                 # nodes, input features
    H = [32, 32, 32, 32, 32]      # hidden sizes h[0..4]
    OUT = 8                       # output embedding size

    kx, ke, kp = jax.random.split(key, 3)
    x = jax.random.normal(kx, (N, F), jnp.float32)
    edge_index = jax.random.randint(ke, (2, 256), 0, N, dtype=jnp.int32)

    a_hat = build_normalized_adjacency(edge_index, N)
    params = init_params(kp, F, H, OUT)

    out = node_glam_forward(x, a_hat, params)
    out = jax.block_until_ready(out)
    assert out.shape == (N, OUT) and out.dtype == jnp.float32
    assert bool(jnp.all(jnp.isfinite(out)))

    print("KERNEL_OK")
</pallas_src>

<mosaic_0001>
module attributes {stable_mosaic.version = 11 : i64} {
  func.func @node_glam_kernel(%arg0: memref<64x16xf32, #tpu.memory_space<vmem>>, %arg1: memref<3x64x64xbf16, #tpu.memory_space<vmem>>, %arg2: memref<8x128xf32, #tpu.memory_space<vmem>>, %arg3: memref<16x32xbf16, #tpu.memory_space<vmem>>, %arg4: memref<128x32xbf16, #tpu.memory_space<vmem>>, %arg5: memref<32x32xbf16, #tpu.memory_space<vmem>>, %arg6: memref<128x32xbf16, #tpu.memory_space<vmem>>, %arg7: memref<16x32xbf16, #tpu.memory_space<vmem>>, %arg8: memref<32x32xbf16, #tpu.memory_space<vmem>>, %arg9: memref<32x128xbf16, #tpu.memory_space<vmem>>, %arg10: memref<64x128xf32, #tpu.memory_space<vmem>>) attributes {dimension_semantics = [], scalar_prefetch = 0 : i64, scratch_operands = 0 : i64, tpu.core_type = #tpu.core_type<tc>} {
    %c0 = arith.constant 0 : index
    %c0_0 = arith.constant 0 : index
    %0 = vector.load %arg0[%c0, %c0_0] : memref<64x16xf32, #tpu.memory_space<vmem>>, vector<64x16xf32>
    %cst = arith.constant dense<0.000000e+00> : vector<16xf32>
    %1 = vector.multi_reduction <add>, %0, %cst [0] : vector<64x16xf32> to vector<16xf32>
    %2 = vector.shape_cast %1 : vector<16xf32> to vector<1x16xf32>
    %cst_1 = arith.constant 6.400000e+01 : f32
    %3 = vector.broadcast %cst_1 : f32 to vector<1x16xf32>
    %4 = arith.divf %2, %3 : vector<1x16xf32>
    %5 = vector.broadcast %4 : vector<1x16xf32> to vector<64x16xf32>
    %6 = arith.subf %0, %5 : vector<64x16xf32>
    %7 = arith.mulf %6, %6 : vector<64x16xf32>
    %cst_2 = arith.constant dense<0.000000e+00> : vector<16xf32>
    %8 = vector.multi_reduction <add>, %7, %cst_2 [0] : vector<64x16xf32> to vector<16xf32>
    %9 = vector.shape_cast %8 : vector<16xf32> to vector<1x16xf32>
    %cst_3 = arith.constant 6.400000e+01 : f32
    %10 = vector.broadcast %cst_3 : f32 to vector<1x16xf32>
    %11 = arith.divf %9, %10 : vector<1x16xf32>
    %c0_4 = arith.constant 0 : index
    %c0_5 = arith.constant 0 : index
    %12 = vector.load %arg2[%c0_4, %c0_5] : memref<8x128xf32, #tpu.memory_space<vmem>>, vector<1x16xf32>
    %cst_6 = arith.constant 9.99999974E-6 : f32
    %13 = vector.broadcast %cst_6 : f32 to vector<1x16xf32>
    %14 = arith.addf %11, %13 : vector<1x16xf32>
    %15 = math.rsqrt %14 : vector<1x16xf32>
    %16 = arith.mulf %12, %15 : vector<1x16xf32>
    %c1 = arith.constant 1 : index
    %c0_7 = arith.constant 0 : index
    %17 = vector.load %arg2[%c1, %c0_7] : memref<8x128xf32, #tpu.memory_space<vmem>>, vector<1x16xf32>
    %18 = arith.mulf %4, %16 : vector<1x16xf32>
    %19 = arith.subf %17, %18 : vector<1x16xf32>
    %20 = vector.broadcast %16 : vector<1x16xf32> to vector<64x16xf32>
    %21 = arith.mulf %0, %20 : vector<64x16xf32>
    %22 = vector.broadcast %19 : vector<1x16xf32> to vector<64x16xf32>
    %23 = arith.addf %21, %22 : vector<64x16xf32>
    %24 = arith.truncf %23 : vector<64x16xf32> to vector<64x16xbf16>
    %c0_8 = arith.constant 0 : index
    %c0_9 = arith.constant 0 : index
    %25 = vector.load %arg3[%c0_8, %c0_9] : memref<16x32xbf16, #tpu.memory_space<vmem>>, vector<16x32xbf16>
    %cst_10 = arith.constant dense<0.000000e+00> : vector<64x32xf32>
    %26 = tpu.matmul %24, %25, %cst_10 {dimension_numbers = #tpu.dot_dimension_numbers<[1], [0], [0], [1], [0, 0, 1, 1], [], []>} : vector<64x16xbf16>, vector<16x32xbf16>, vector<64x32xf32> -> vector<64x32xf32>
    %c2 = arith.constant 2 : index
    %c0_11 = arith.constant 0 : index
    %27 = vector.load %arg2[%c2, %c0_11] : memref<8x128xf32, #tpu.memory_space<vmem>>, vector<1x32xf32>
    %28 = vector.broadcast %27 : vector<1x32xf32> to vector<64x32xf32>
    %29 = arith.addf %26, %28 : vector<64x32xf32>
    %cst_12 = arith.constant 5.000000e-01 : f32
    %30 = vector.broadcast %cst_12 : f32 to vector<64x32xf32>
    %31 = arith.mulf %30, %29 : vector<64x32xf32>
    %cst_13 = arith.constant 0.707106769 : f32
    %32 = vector.broadcast %cst_13 : f32 to vector<64x32xf32>
    %33 = arith.mulf %29, %32 : vector<64x32xf32>
    %34 = math.erf %33 : vector<64x32xf32>
    %cst_14 = arith.constant 1.000000e+00 : f32
    %35 = vector.broadcast %cst_14 : f32 to vector<64x32xf32>
    %36 = arith.addf %35, %34 : vector<64x32xf32>
    %37 = arith.mulf %31, %36 : vector<64x32xf32>
    %c0_15 = arith.constant 0 : index
    %c0_16 = arith.constant 0 : index
    %38 = vector.load %arg4[%c0_15, %c0_16] : memref<128x32xbf16, #tpu.memory_space<vmem>>, vector<128x32xbf16>
    %c3 = arith.constant 3 : index
    %c0_17 = arith.constant 0 : index
    %39 = vector.load %arg2[%c3, %c0_17] : memref<8x128xf32, #tpu.memory_space<vmem>>, vector<1x32xf32>
    %40 = arith.truncf %37 : vector<64x32xf32> to vector<64x32xbf16>
    %c0_18 = arith.constant 0 : index
    %c0_19 = arith.constant 0 : index
    %c0_20 = arith.constant 0 : index
    %41 = vector.load %arg1[%c0_18, %c0_19, %c0_20] : memref<3x64x64xbf16, #tpu.memory_space<vmem>>, vector<1x64x64xbf16>
    %42 = vector.shape_cast %41 : vector<1x64x64xbf16> to vector<64x64xbf16>
    %cst_21 = arith.constant dense<0.000000e+00> : vector<64x32xf32>
    %43 = tpu.matmul %42, %40, %cst_21 {dimension_numbers = #tpu.dot_dimension_numbers<[1], [0], [0], [1], [0, 0, 1, 1], [], []>} : vector<64x64xbf16>, vector<64x32xbf16>, vector<64x32xf32> -> vector<64x32xf32>
    %44 = arith.truncf %43 : vector<64x32xf32> to vector<64x32xbf16>
    %c1_22 = arith.constant 1 : index
    %c0_23 = arith.constant 0 : index
    %c0_24 = arith.constant 0 : index
    %45 = vector.load %arg1[%c1_22, %c0_23, %c0_24] : memref<3x64x64xbf16, #tpu.memory_space<vmem>>, vector<1x64x64xbf16>
    %46 = vector.shape_cast %45 : vector<1x64x64xbf16> to vector<64x64xbf16>
    %cst_25 = arith.constant dense<0.000000e+00> : vector<64x32xf32>
    %47 = tpu.matmul %46, %40, %cst_25 {dimension_numbers = #tpu.dot_dimension_numbers<[1], [0], [0], [1], [0, 0, 1, 1], [], []>} : vector<64x64xbf16>, vector<64x32xbf16>, vector<64x32xf32> -> vector<64x32xf32>
    %48 = arith.truncf %47 : vector<64x32xf32> to vector<64x32xbf16>
    %c2_26 = arith.constant 2 : index
    %c0_27 = arith.constant 0 : index
    %c0_28 = arith.constant 0 : index
    %49 = vector.load %arg1[%c2_26, %c0_27, %c0_28] : memref<3x64x64xbf16, #tpu.memory_space<vmem>>, vector<1x64x64xbf16>
    %50 = vector.shape_cast %49 : vector<1x64x64xbf16> to vector<64x64xbf16>
    %cst_29 = arith.constant dense<0.000000e+00> : vector<64x32xf32>
    %51 = tpu.matmul %50, %40, %cst_29 {dimension_numbers = #tpu.dot_dimension_numbers<[1], [0], [0], [1], [0, 0, 1, 1], [], []>} : vector<64x64xbf16>, vector<64x32xbf16>, vector<64x32xf32> -> vector<64x32xf32>
    %52 = arith.truncf %51 : vector<64x32xf32> to vector<64x32xbf16>
    %53 = tpu.concatenate %40, %44, %48, %52 in 1 : vector<64x32xbf16>, vector<64x32xbf16>, vector<64x32xbf16>, vector<64x32xbf16> -> vector<64x128xbf16>
    %cst_30 = arith.constant dense<0.000000e+00> : vector<64x32xf32>
    %54 = tpu.matmul %53, %38, %cst_30 {dimension_numbers = #tpu.dot_dimension_numbers<[1], [0], [0], [1], [0, 0, 1, 1], [], []>} : vector<64x128xbf16>, vector<128x32xbf16>, vector<64x32xf32> -> vector<64x32xf32>
    %55 = vector.broadcast %39 : vector<1x32xf32> to vector<64x32xf32>
    %56 = arith.addf %54, %55 : vector<64x32xf32>
    %cst_31 = arith.constant 5.000000e-01 : f32
    %57 = vector.broadcast %cst_31 : f32 to vector<64x32xf32>
    %58 = arith.mulf %57, %56 : vector<64x32xf32>
    %cst_32 = arith.constant 0.707106769 : f32
    %59 = vector.broadcast %cst_32 : f32 to vector<64x32xf32>
    %60 = arith.mulf %56, %59 : vector<64x32xf32>
    %61 = math.erf %60 : vector<64x32xf32>
    %cst_33 = arith.constant 1.000000e+00 : f32
    %62 = vector.broadcast %cst_33 : f32 to vector<64x32xf32>
    %63 = arith.addf %62, %61 : vector<64x32xf32>
    %64 = arith.mulf %58, %63 : vector<64x32xf32>
    %65 = arith.truncf %64 : vector<64x32xf32> to vector<64x32xbf16>
    %c0_34 = arith.constant 0 : index
    %c0_35 = arith.constant 0 : index
    %66 = vector.load %arg5[%c0_34, %c0_35] : memref<32x32xbf16, #tpu.memory_space<vmem>>, vector<32x32xbf16>
    %cst_36 = arith.constant dense<0.000000e+00> : vector<64x32xf32>
    %67 = tpu.matmul %65, %66, %cst_36 {dimension_numbers = #tpu.dot_dimension_numbers<[1], [0], [0], [1], [0, 0, 1, 1], [], []>} : vector<64x32xbf16>, vector<32x32xbf16>, vector<64x32xf32> -> vector<64x32xf32>
    %c4 = arith.constant 4 : index
    %c0_37 = arith.constant 0 : index
    %68 = vector.load %arg2[%c4, %c0_37] : memref<8x128xf32, #tpu.memory_space<vmem>>, vector<1x32xf32>
    %69 = vector.broadcast %68 : vector<1x32xf32> to vector<64x32xf32>
    %70 = arith.addf %67, %69 : vector<64x32xf32>
    %cst_38 = arith.constant 5.000000e-01 : f32
    %71 = vector.broadcast %cst_38 : f32 to vector<64x32xf32>
    %72 = arith.mulf %71, %70 : vector<64x32xf32>
    %cst_39 = arith.constant 0.707106769 : f32
    %73 = vector.broadcast %cst_39 : f32 to vector<64x32xf32>
    %74 = arith.mulf %70, %73 : vector<64x32xf32>
    %75 = math.erf %74 : vector<64x32xf32>
    %cst_40 = arith.constant 1.000000e+00 : f32
    %76 = vector.broadcast %cst_40 : f32 to vector<64x32xf32>
    %77 = arith.addf %76, %75 : vector<64x32xf32>
    %78 = arith.mulf %72, %77 : vector<64x32xf32>
    %c0_41 = arith.constant 0 : index
    %c0_42 = arith.constant 0 : index
    %79 = vector.load %arg6[%c0_41, %c0_42] : memref<128x32xbf16, #tpu.memory_space<vmem>>, vector<128x32xbf16>
    %c5 = arith.constant 5 : index
    %c0_43 = arith.constant 0 : index
    %80 = vector.load %arg2[%c5, %c0_43] : memref<8x128xf32, #tpu.memory_space<vmem>>, vector<1x32xf32>
    %81 = arith.truncf %78 : vector<64x32xf32> to vector<64x32xbf16>
    %c0_44 = arith.constant 0 : index
    %c0_45 = arith.constant 0 : index
    %c0_46 = arith.constant 0 : index
    %82 = vector.load %arg1[%c0_44, %c0_45, %c0_46] : memref<3x64x64xbf16, #tpu.memory_space<vmem>>, vector<1x64x64xbf16>
    %83 = vector.shape_cast %82 : vector<1x64x64xbf16> to vector<64x64xbf16>
    %cst_47 = arith.constant dense<0.000000e+00> : vector<64x32xf32>
    %84 = tpu.matmul %83, %81, %cst_47 {dimension_numbers = #tpu.dot_dimension_numbers<[1], [0], [0], [1], [0, 0, 1, 1], [], []>} : vector<64x64xbf16>, vector<64x32xbf16>, vector<64x32xf32> -> vector<64x32xf32>
    %85 = arith.truncf %84 : vector<64x32xf32> to vector<64x32xbf16>
    %c1_48 = arith.constant 1 : index
    %c0_49 = arith.constant 0 : index
    %c0_50 = arith.constant 0 : index
    %86 = vector.load %arg1[%c1_48, %c0_49, %c0_50] : memref<3x64x64xbf16, #tpu.memory_space<vmem>>, vector<1x64x64xbf16>
    %87 = vector.shape_cast %86 : vector<1x64x64xbf16> to vector<64x64xbf16>
    %cst_51 = arith.constant dense<0.000000e+00> : vector<64x32xf32>
    %88 = tpu.matmul %87, %81, %cst_51 {dimension_numbers = #tpu.dot_dimension_numbers<[1], [0], [0], [1], [0, 0, 1, 1], [], []>} : vector<64x64xbf16>, vector<64x32xbf16>, vector<64x32xf32> -> vector<64x32xf32>
    %89 = arith.truncf %88 : vector<64x32xf32> to vector<64x32xbf16>
    %c2_52 = arith.constant 2 : index
    %c0_53 = arith.constant 0 : index
    %c0_54 = arith.constant 0 : index
    %90 = vector.load %arg1[%c2_52, %c0_53, %c0_54] : memref<3x64x64xbf16, #tpu.memory_space<vmem>>, vector<1x64x64xbf16>
    %91 = vector.shape_cast %90 : vector<1x64x64xbf16> to vector<64x64xbf16>
    %cst_55 = arith.constant dense<0.000000e+00> : vector<64x32xf32>
    %92 = tpu.matmul %91, %81, %cst_55 {dimension_numbers = #tpu.dot_dimension_numbers<[1], [0], [0], [1], [0, 0, 1, 1], [], []>} : vector<64x64xbf16>, vector<64x32xbf16>, vector<64x32xf32> -> vector<64x32xf32>
    %93 = arith.truncf %92 : vector<64x32xf32> to vector<64x32xbf16>
    %94 = tpu.concatenate %81, %85, %89, %93 in 1 : vector<64x32xbf16>, vector<64x32xbf16>, vector<64x32xbf16>, vector<64x32xbf16> -> vector<64x128xbf16>
    %cst_56 = arith.constant dense<0.000000e+00> : vector<64x32xf32>
    %95 = tpu.matmul %94, %79, %cst_56 {dimension_numbers = #tpu.dot_dimension_numbers<[1], [0], [0], [1], [0, 0, 1, 1], [], []>} : vector<64x128xbf16>, vector<128x32xbf16>, vector<64x32xf32> -> vector<64x32xf32>
    %96 = vector.broadcast %80 : vector<1x32xf32> to vector<64x32xf32>
    %97 = arith.addf %95, %96 : vector<64x32xf32>
    %cst_57 = arith.constant 5.000000e-01 : f32
    %98 = vector.broadcast %cst_57 : f32 to vector<64x32xf32>
    %99 = arith.mulf %98, %97 : vector<64x32xf32>
    %cst_58 = arith.constant 0.707106769 : f32
    %100 = vector.broadcast %cst_58 : f32 to vector<64x32xf32>
    %101 = arith.mulf %97, %100 : vector<64x32xf32>
    %102 = math.erf %101 : vector<64x32xf32>
    %cst_59 = arith.constant 1.000000e+00 : f32
    %103 = vector.broadcast %cst_59 : f32 to vector<64x32xf32>
    %104 = arith.addf %103, %102 : vector<64x32xf32>
    %105 = arith.mulf %99, %104 : vector<64x32xf32>
    %106 = arith.truncf %0 : vector<64x16xf32> to vector<64x16xbf16>
    %c0_60 = arith.constant 0 : index
    %c0_61 = arith.constant 0 : index
    %107 = vector.load %arg7[%c0_60, %c0_61] : memref<16x32xbf16, #tpu.memory_space<vmem>>, vector<16x32xbf16>
    %cst_62 = arith.constant dense<0.000000e+00> : vector<64x32xf32>
    %108 = tpu.matmul %106, %107, %cst_62 {dimension_numbers = #tpu.dot_dimension_numbers<[1], [0], [0], [1], [0, 0, 1, 1], [], []>} : vector<64x16xbf16>, vector<16x32xbf16>, vector<64x32xf32> -> vector<64x32xf32>
    %109 = arith.truncf %105 : vector<64x32xf32> to vector<64x32xbf16>
    %c0_63 = arith.constant 0 : index
    %c0_64 = arith.constant 0 : index
    %110 = vector.load %arg8[%c0_63, %c0_64] : memref<32x32xbf16, #tpu.memory_space<vmem>>, vector<32x32xbf16>
    %cst_65 = arith.constant dense<0.000000e+00> : vector<64x32xf32>
    %111 = tpu.matmul %109, %110, %cst_65 {dimension_numbers = #tpu.dot_dimension_numbers<[1], [0], [0], [1], [0, 0, 1, 1], [], []>} : vector<64x32xbf16>, vector<32x32xbf16>, vector<64x32xf32> -> vector<64x32xf32>
    %112 = arith.addf %108, %111 : vector<64x32xf32>
    %c6 = arith.constant 6 : index
    %c0_66 = arith.constant 0 : index
    %113 = vector.load %arg2[%c6, %c0_66] : memref<8x128xf32, #tpu.memory_space<vmem>>, vector<1x32xf32>
    %114 = vector.broadcast %113 : vector<1x32xf32> to vector<64x32xf32>
    %115 = arith.addf %112, %114 : vector<64x32xf32>
    %cst_67 = arith.constant 5.000000e-01 : f32
    %116 = vector.broadcast %cst_67 : f32 to vector<64x32xf32>
    %117 = arith.mulf %116, %115 : vector<64x32xf32>
    %cst_68 = arith.constant 0.707106769 : f32
    %118 = vector.broadcast %cst_68 : f32 to vector<64x32xf32>
    %119 = arith.mulf %115, %118 : vector<64x32xf32>
    %120 = math.erf %119 : vector<64x32xf32>
    %cst_69 = arith.constant 1.000000e+00 : f32
    %121 = vector.broadcast %cst_69 : f32 to vector<64x32xf32>
    %122 = arith.addf %121, %120 : vector<64x32xf32>
    %123 = arith.mulf %117, %122 : vector<64x32xf32>
    %124 = arith.truncf %123 : vector<64x32xf32> to vector<64x32xbf16>
    %c0_70 = arith.constant 0 : index
    %c0_71 = arith.constant 0 : index
    %125 = vector.load %arg9[%c0_70, %c0_71] : memref<32x128xbf16, #tpu.memory_space<vmem>>, vector<32x128xbf16>
    %cst_72 = arith.constant dense<0.000000e+00> : vector<64x128xf32>
    %126 = tpu.matmul %124, %125, %cst_72 {dimension_numbers = #tpu.dot_dimension_numbers<[1], [0], [0], [1], [0, 0, 1, 1], [], []>} : vector<64x32xbf16>, vector<32x128xbf16>, vector<64x128xf32> -> vector<64x128xf32>
    %c7 = arith.constant 7 : index
    %c0_73 = arith.constant 0 : index
    %127 = vector.load %arg2[%c7, %c0_73] : memref<8x128xf32, #tpu.memory_space<vmem>>, vector<1x128xf32>
    %128 = vector.broadcast %127 : vector<1x128xf32> to vector<64x128xf32>
    %129 = arith.addf %126, %128 : vector<64x128xf32>
    %c0_74 = arith.constant 0 : index
    %c0_75 = arith.constant 0 : index
    %130 = vector.load %arg10[%c0_74, %c0_75] : memref<64x128xf32, #tpu.memory_space<vmem>>, vector<64x128xf32>
    tpu.vector_store %arg10[%c0_74, %c0_75], %129 {strides = array<i32>} : memref<64x128xf32, #tpu.memory_space<vmem>>, vector<64x128xf32>,
    return
  }
}

</mosaic_0001>

<bundles_post_ra>
// kernel: tpu_custom_call.1
= control target key start
LH: loop header
LB: loop body
LE: loop exit
PB: predicated region body
PF: predicated region fallthrough
CT: control target
= control target key end

     0   :  { %vm45_vm0 = vcmask 130048   ;;  %s2882_s0 = inlined_call_operand.vmem [shape: f32[64,16], index: 0, kind: input, shape index: {}]   ;;  %s2883_s1 = inlined_call_operand.vmem [shape: bf16[3,64,64], index: 1, kind: input, shape index: {}]   ;;  %s2884_s2 = inlined_call_operand.vmem [shape: f32[8,128], index: 2, kind: input, shape index: {}]   ;;  %s2885_s3 = inlined_call_operand.vmem [shape: bf16[16,32], index: 3, kind: input, shape index: {}]   ;;  %s2886_s4 = inlined_call_operand.vmem [shape: bf16[128,32], index: 4, kind: input, shape index: {}]   ;;  %s2887_s5 = inlined_call_operand.vmem [shape: bf16[32,32], index: 5, kind: input, shape index: {}]   ;;  %s2888_s6 = inlined_call_operand.vmem [shape: bf16[128,32], index: 6, kind: input, shape index: {}]   ;;  %s2889_s7 = inlined_call_operand.vmem [shape: bf16[16,32], index: 7, kind: input, shape index: {}]   ;;  %s2890_s8 = inlined_call_operand.vmem [shape: bf16[32,32], index: 8, kind: input, shape index: {}]   ;;  %s2891_s9 = inlined_call_operand.vmem [shape: bf16[32,128], index: 9, kind: input, shape index: {}]   ;;  %s2892_s10 = inlined_call_operand.hbm [shape: f32[64,128], index: 10, kind: output, shape index: {}]  }
   0x1   :  { %v2218_v0 = vld [vmem:[%s2885_s3] sm:$0xff]   ;;  %v2438_v2 = vld [vmem:[%s2882_s0 + $0x8] sm:$0xff]  ;;  %v2443_v3 = vld [vmem:[%s2882_s0 + $0x10] sm:$0xff] }
   0x2   :  { %v2433_v1 = vld [vmem:[%s2882_s0] sm:$0xff]  ;;  %2012 = vmatprep.subr.bf16.mxu0 %v2218_v0  ;;  %v2448_v4 = vld [vmem:[%s2882_s0 + $0x18] sm:$0xff]  ;;  %v2458_v6 = vld [vmem:[%s2882_s0 + $0x28] sm:$0xff]  ;;  %v47_v8 = vsel %vm45_vm0, %v2438_v2, 0.0  ;;  %v49_v9 = vsel %vm45_vm0, %v2443_v3, 0.0 }
   0x3   :  { %v2453_v5 = vld [vmem:[%s2882_s0 + $0x20] sm:$0xff]  ;;  %v46_v7 = vsel %vm45_vm0, %v2433_v1, 0.0  ;;  %2013 = vmatpush3.bf16.msra.mxu0 %v2218_v0  ;;  %v2469_v11 = vld [vmem:[%s2882_s0 + $0x30] sm:$0xff]  ;;  %v2474_v12 = vld [vmem:[%s2882_s0 + $0x38] sm:$0xff]  ;;  %v51_v13 = vsel %vm45_vm0, %v2448_v4, 0.0  ;;  %v55_v16 = vsel %vm45_vm0, %v2458_v6, 0.0 }
   0x4   :  { %v48_v10 = vadd.f32 %v47_v8, %v46_v7  ;;  %v53_v15 = vsel %vm45_vm0, %v2453_v5, 0.0  ;;  %v57_v18 = vsel %vm45_vm0, %v2469_v11, 0.0  ;;  %v59_v19 = vsel %vm45_vm0, %v2474_v12, 0.0 }
   0x6   :  { %v50_v14 = vadd.f32 %v49_v9, %v48_v10 }
   0x8   :  { %v52_v17 = vadd.f32 %v51_v13, %v50_v14 }
   0xa   :  { %v54_v20 = vadd.f32 %v53_v15, %v52_v17 }
   0xc   :  { %v56_v21 = vadd.f32 %v55_v16, %v54_v20 }
   0xe   :  { %v58_v22 = vadd.f32 %v57_v18, %v56_v21 }
  0x10   :  { %v60_v23 = vadd.f32 %v59_v19, %v58_v22 }
  0x12   :  { %v61_v24 = vrot.slane %v60_v23, 4 }
  0x14   :  { %v62_v25 = vadd.f32 %v61_v24, %v60_v23 }
  0x16   :  { %v63_v26 = vrot.slane %v62_v25, 2 }
  0x18   :  { %v64_v27 = vadd.f32 %v63_v26, %v62_v25 }
  0x1a   :  { %v65_v28 = vrot.slane %v64_v27, 1 }
  0x1c   :  { %v66_v29 = vadd.f32 %v65_v28, %v64_v27 }
  0x1e   :  { %v68_v30 = vmul.f32 0.015625, %v66_v29 }
  0x1f   :  { %15 = vsyncpa [#allocation3], 0  ;;  %v114_v14 = vlaneseq  ;;  %v107_v16 = vld [vmem:[%s2884_s2] sm:$0x1]  ;;  %v111_v20 = vld [vmem:[%s2884_s2 + $0x1] sm:$0x1] }
  0x20   :  { %v69_v31 = vsub.f32 %v2433_v1, %v68_v30  ;;  %v70_v32 = vsub.f32 %v2438_v2, %v68_v30  ;;  %v71_v33 = vsub.f32 %v2443_v3, %v68_v30  ;;  %v72_v34 = vsub.f32 %v2448_v4, %v68_v30  ;;  %s2366_s11 = smov 64   ;;  %s2367_s12 = smov 32  }
  0x21   :  { %v73_v35 = vsub.f32 %v2453_v5, %v68_v30  ;;  %v74_v36 = vsub.f32 %v2458_v6, %v68_v30  ;;  %v75_v41 = vsub.f32 %v2469_v11, %v68_v30  ;;  %v76_v47 = vsub.f32 %v2474_v12, %v68_v30 }
  0x22   :  { %v77_v37 = vmul.f32 %v69_v31, %v69_v31  ;;  %v78_v38 = vmul.f32 %v70_v32, %v70_v32  ;;  %v79_v39 = vmul.f32 %v71_v33, %v71_v33  ;;  %v80_v40 = vmul.f32 %v72_v34, %v72_v34 }
  0x23   :  { %v81_v42 = vmul.f32 %v73_v35, %v73_v35  ;;  %v82_v48 = vmul.f32 %v74_v36, %v74_v36  ;;  %v83_v51 = vmul.f32 %v75_v41, %v75_v41  ;;  %v84_v54 = vmul.f32 %v76_v47, %v76_v47 }
  0x24   :  { %v85_v43 = vsel %vm45_vm0, %v77_v37, 0.0  ;;  %v86_v44 = vsel %vm45_vm0, %v78_v38, 0.0  ;;  %v88_v45 = vsel %vm45_vm0, %v79_v39, 0.0  ;;  %v90_v49 = vsel %vm45_vm0, %v80_v40, 0.0 }
  0x25   :  { %v87_v46 = vadd.f32 %v86_v44, %v85_v43  ;;  %v92_v52 = vsel %vm45_vm0, %v81_v42, 0.0  ;;  %v94_v55 = vsel %vm45_vm0, %v82_v48, 0.0  ;;  %v96_v57 = vsel %vm45_vm0, %v83_v51, 0.0  ;;  %v1810_v43 = vld [vmem:[%s2884_s2 + $0x2] ss:$0 sm:$0xff] }
  0x26   :  { %v98_v59 = vsel %vm45_vm0, %v84_v54, 0.0  ;;  %v115_v15 = vshrl.u32 %v114_v14, 7  ;;  %vm321_vm1 = vcmask 523264   ;;  %vm659_vm2 = vcmask 261120  }
  0x27   :  { %v89_v50 = vadd.f32 %v88_v45, %v87_v46  ;;  %vm680_vm3 = vcmask 785408  }
  0x28   :  { %v116_v17 = vsub.s32 0, %v115_v15 }
  0x29   :  { %v91_v53 = vadd.f32 %v90_v49, %v89_v50 }
  0x2b   :  { %v93_v56 = vadd.f32 %v92_v52, %v91_v53 }
  0x2d   :  { %v95_v58 = vadd.f32 %v94_v55, %v93_v56 }
  0x2f   :  { %v97_v60 = vadd.f32 %v96_v57, %v95_v58 }
  0x31   :  { %v99_v61 = vadd.f32 %v98_v59, %v97_v60 }
  0x33   :  { %v100_v62 = vrot.slane %v99_v61, 4 }
  0x35   :  { %v101_v63 = vadd.f32 %v100_v62, %v99_v61 }
  0x37   :  { %v102_v0 = vrot.slane %v101_v63, 2 }
  0x39   :  { %v103_v7 = vadd.f32 %v102_v0, %v101_v63 }
  0x3b   :  { %v104_v8 = vrot.slane %v103_v7, 1 }
  0x3d   :  { %v105_v9 = vadd.f32 %v104_v8, %v103_v7 }
  0x3f   :  { %v106_v10 = vmul.f32 0.015625, %v105_v9 }
  0x41   :  { %v108_v13 = vadd.f32 1e-05, %v106_v10 }
  0x43   :  { %2254 = vrsqrt.f32 %v108_v13 }
  0x50   :  { %v2255_v18 = vpop.eup %2254 }
  0x51   :  { %v110_v19 = vmul.f32 %v2255_v18, %v107_v16 }
  0x53   :  { %v112_v21 = vmul.f32 %v110_v19, %v68_v30  ;;  %v117_v22 = vrot.slane %v110_v19, %v116_v17 }
  0x55   :  { %v113_v23 = vsub.f32 %v111_v20, %v112_v21  ;;  %v118_v24 = vmul.f32 %v117_v22, %v2433_v1  ;;  %v119_v25 = vmul.f32 %v117_v22, %v2438_v2  ;;  %v120_v26 = vmul.f32 %v117_v22, %v2443_v3 }
  0x56   :  { %v121_v27 = vmul.f32 %v117_v22, %v2448_v4  ;;  %v122_v28 = vmul.f32 %v117_v22, %v2453_v5  ;;  %v123_v29 = vmul.f32 %v117_v22, %v2458_v6  ;;  %v124_v37 = vmul.f32 %v117_v22, %v2469_v11  ;;  %v2523_v11 = vld [vmem:[%s2883_s1] sm:$0xff]  }
  0x57   :  { %v129_v31 = vrot.slane %v113_v23, %v116_v17  ;;  %v125_v1 = vmul.f32 %v117_v22, %v2474_v12  ;;  %v2528_v12 = vld [vmem:[%s2883_s1 + $0x20] sm:$0xff]   ;;  %2030 = vmatprep.mubr.msk.bf16.mxu1 %vm321_vm1, %v2523_v11 }
  0x59   :  { %v130_v32 = vadd.f32 %v129_v31, %v118_v24  ;;  %v131_v33 = vadd.f32 %v129_v31, %v119_v25  ;;  %v132_v34 = vadd.f32 %v129_v31, %v120_v26  ;;  %v133_v35 = vadd.f32 %v129_v31, %v121_v27 }
  0x5a   :  { %v134_v30 = vadd.f32 %v129_v31, %v122_v28  ;;  %v135_v36 = vadd.f32 %v129_v31, %v123_v29  ;;  %v136_v4 = vadd.f32 %v129_v31, %v124_v37  ;;  %v137_v5 = vadd.f32 %v129_v31, %v125_v1 }
  0x5b   :  { %v138_v2 = vpack.c.bf16 %v131_v33, %v130_v32  ;;  %v139_v38 = vpack.c.bf16 %v133_v35, %v132_v34 }
  0x5c   :  { %v140_v3 = vpack.c.bf16 %v135_v36, %v134_v30  ;;  %v141_v6 = vpack.c.bf16 %v137_v5, %v136_v4 }
  0x5d   :  { %2014 = vmatprep.mubr.msk.bf16.mxu0 %vm45_vm0, %v138_v2 }
  0x5e   :  { %2015 = vmatmul.mubr.msk.bf16.vlgmr.msra.gmra.mxu0 %vm45_vm0, %v139_v38 }
  0x5f   :  { %2018 = vmatprep.mubr.msk.bf16.mxu0 %vm45_vm0, %v140_v3 }
  0x66   :  { %2019 = vmatmul.mubr.msk.bf16.gmra.mxu0 %vm45_vm0, %v141_v6  ;;  %v2562_v6 = vld [vmem:[%s2883_s1 + $0x8] sm:$0xff]  }
  0x67   :  { %2046 = vmatprep.mubr.msk.bf16.mxu0 %vm321_vm1, %v2528_v12 }
 0x11e   :  { %v2016_v39 = vpop.f32.mrf.mxu0 }
 0x11f   :  { %v210_v47 = vadd.f32 %v2016_v39, %v1810_v43  ;;  %v2567_v39 = vld [vmem:[%s2883_s1 + $0x28] sm:$0xff]  }
 0x120   :  { %v201_v40 = vpop.f32.mrf.mxu0 }
 0x121   :  { %v242_v56 = vmul.f32 0.70710677, %v210_v47  ;;  %v202_v58 = vadd.f32 %v1810_v43, %v201_v40  ;;  %v234_v33 = vmul.f32 0.5, %v210_v47  ;;  %v2574_v40 = vld [vmem:[%s2883_s1 + $0x10] sm:$0xff]   ;;  %v2635_v47 = vld [vmem:[%s2883_s1 + $0x58] sm:$0xff]  }
 0x122   :  { %v2017_v41 = vpop.f32.mrf.mxu0 }
 0x123   :  { %v213_v44 = vadd.f32 %v2017_v41, %v1810_v43  ;;  %v240_v63 = vmul.f32 0.70710677, %v202_v58  ;;  %v232_v2 = vmul.f32 0.5, %v202_v58  ;;  %v2580_v41 = vld [vmem:[%s2883_s1 + $0x30] sm:$0xff]  }
 0x124   :  { %v204_v42 = vpop.f32.mrf.mxu0 }
 0x125   :  { %v243_v51 = vmul.f32 0.70710677, %v213_v44  ;;  %v205_v53 = vadd.f32 %v1810_v43, %v204_v42  ;;  %v235_v26 = vmul.f32 0.5, %v213_v44  ;;  %v2595_v42 = vld [vmem:[%s2883_s1 + $0x18] sm:$0xff]   ;;  %v2606_v44 = vld [vmem:[%s2883_s1 + $0x40] sm:$0xff]  }
 0x126   :  { %v2020_v45 = vpop.f32.mrf.mxu0 }
 0x127   :  { %v226_v46 = vadd.f32 %v2020_v45, %v1810_v43  ;;  %v241_v61 = vmul.f32 0.70710677, %v205_v53  ;;  %v233_v1 = vmul.f32 0.5, %v205_v53  ;;  %v2620_v45 = vld [vmem:[%s2883_s1 + $0x48] sm:$0xff]  }
 0x128   :  { %v217_v48 = vpop.f32.mrf.mxu0 }
 0x129   :  { %v246_v49 = vmul.f32 0.70710677, %v226_v46  ;;  %v218_v50 = vadd.f32 %v1810_v43, %v217_v48  ;;  %v238_v14 = vmul.f32 0.5, %v226_v46  ;;  %v2626_v46 = vld [vmem:[%s2883_s1 + $0x50] sm:$0xff]   ;;  %v2231_v48 = vld [vmem:[%s2886_s4 + $0x38] sm:$0xff]  }
 0x12a   :  { %v2021_v52 = vpop.f32.mrf.mxu0 }
 0x12b   :  { %2256 = verf.f32 %v246_v49  ;;  %v244_v54 = vmul.f32 0.70710677, %v218_v50  ;;  %v229_v55 = vadd.f32 %v2021_v52, %v1810_v43  ;;  %v236_v19 = vmul.f32 0.5, %v218_v50  ;;  %v2232_v49 = vld [vmem:[%s2886_s4 + $0x30] sm:$0xff]   ;;  %v2233_v50 = vld [vmem:[%s2886_s4 + $0x28] sm:$0xff]   ;;  %v2235_v52 = vld [vmem:[%s2886_s4 + $0x18] sm:$0xff]  }
 0x12c   :  { %v220_v57 = vpop.f32.mrf.mxu0 }
 0x12d   :  { %2258 = verf.f32 %v244_v54  ;;  %v247_v59 = vmul.f32 0.70710677, %v229_v55  ;;  %v221_v60 = vadd.f32 %v1810_v43, %v220_v57  ;;  %v239_v16 = vmul.f32 0.5, %v229_v55  ;;  %v2600_v43 = vld [vmem:[%s2883_s1 + $0x38] sm:$0xff]   ;;  %v2236_v55 = vld [vmem:[%s2886_s4 + $0x10] sm:$0xff]  }
 0x12e   :  { %2260 = verf.f32 %v243_v51  ;;  %v2234_v51 = vld [vmem:[%s2886_s4 + $0x20] sm:$0xff]  }
 0x12f   :  { %2262 = verf.f32 %v247_v59  ;;  %v245_v62 = vmul.f32 0.70710677, %v221_v60  ;;  %v237_v20 = vmul.f32 0.5, %v221_v60  ;;  %v2237_v60 = vld [vmem:[%s2886_s4 + $0x8] sm:$0xff]  }
 0x130   :  { %2264 = verf.f32 %v242_v56 }
 0x131   :  { %2266 = verf.f32 %v245_v62 }
 0x132   :  { %2268 = verf.f32 %v241_v61 }
 0x133   :  { %2270 = verf.f32 %v240_v63 }
 0x138   :  { %v2257_v0 = vpop.eup %2256 }
 0x139   :  { %v262_v9 = vadd.f32 1.0, %v2257_v0 }
 0x13a   :  { %v2259_v7 = vpop.eup %2258 }
 0x13b   :  { %v2261_v8 = vpop.eup %2260  ;;  %v260_v15 = vadd.f32 1.0, %v2259_v7  ;;  %v270_v22 = vmul.f32 %v262_v9, %v238_v14  ;;  %v2238_v9 = vld [vmem:[%s2886_s4] sm:$0xff]   ;;  %s2368_s4 = smov 96  }
 0x13c   :  { %v2263_v10 = vpop.eup %2262  ;;  %v259_v21 = vadd.f32 1.0, %v2261_v8 }
 0x13d   :  { %v2265_v13 = vpop.eup %2264  ;;  %v263_v17 = vadd.f32 1.0, %v2263_v10  ;;  %v268_v28 = vmul.f32 %v260_v15, %v236_v19 }
 0x13e   :  { %v2267_v18 = vpop.eup %2266  ;;  %v258_v27 = vadd.f32 1.0, %v2265_v13  ;;  %v267_v34 = vmul.f32 %v259_v21, %v235_v26 }
 0x13f   :  { %v271_v23 = vmul.f32 %v263_v17, %v239_v16  ;;  %v261_v24 = vadd.f32 1.0, %v2267_v18  ;;  %v2269_v25 = vpop.eup %2268 }
 0x140   :  { %v2271_v32 = vpop.eup %2270  ;;  %v257_v35 = vadd.f32 1.0, %v2269_v25  ;;  %v266_v36 = vmul.f32 %v258_v27, %v234_v33 }
 0x141   :  { %v2537_v29 = vpack.c.bf16 %v271_v23, %v270_v22  ;;  %v269_v31 = vmul.f32 %v261_v24, %v237_v20  ;;  %v256_v37 = vadd.f32 1.0, %v2271_v32 }
 0x142   :  { %v2547_v38 = vpack.c.bf16 %v267_v34, %v266_v36  ;;  %v265_v3 = vmul.f32 %v257_v35, %v233_v1 }
 0x143   :  { %v2539_v30 = vpack.c.bf16 %v269_v31, %v268_v28  ;;  %2022 = vmatprep.subr.bf16.mxu1 %v2537_v29  ;;  %2038 = vmatprep.subr.bf16.mxu0 %v2537_v29  ;;  %v264_v4 = vmul.f32 %v256_v37, %v232_v2 }
 0x144   :  { %2023 = vmatpush3.bf16.msra.mxu1 %v2537_v29  ;;  %2039 = vmatpush3.bf16.msra.mxu0 %v2537_v29 }
 0x145   :  { %2024 = vmatprep.subr.bf16.mxu1 %v2539_v30  ;;  %2040 = vmatprep.subr.bf16.mxu0 %v2539_v30  ;;  %v2553_v5 = vpack.c.bf16 %v265_v3, %v264_v4 }
 0x148   :  { %2025 = vmatpush3.bf16.msra.mxu1 %v2539_v30  ;;  %2041 = vmatpush3.bf16.msra.mxu0 %v2539_v30 }
 0x149   :  { %2026 = vmatprep.subr.bf16.mxu1 %v2547_v38  ;;  %2042 = vmatprep.subr.bf16.mxu0 %v2547_v38 }
 0x14c   :  { %2027 = vmatpush3.bf16.msra.mxu1 %v2547_v38  ;;  %2043 = vmatpush3.bf16.msra.mxu0 %v2547_v38 }
 0x14d   :  { %2028 = vmatprep.subr.bf16.mxu1 %v2553_v5  ;;  %2044 = vmatprep.subr.bf16.mxu0 %v2553_v5 }
 0x150   :  { %2029 = vmatpush3.bf16.msra.mxu1 %v2553_v5  ;;  %2045 = vmatpush3.bf16.msra.mxu0 %v2553_v5 }
 0x151   :  { %2054 = vmatprep.subr.bf16.mxu1 %v2537_v29  ;;  %2070 = vmatprep.subr.bf16.mxu0 %v2231_v48 }
 0x153   :  { %2031 = vmatmul.mubr.msk.bf16.vlgmr.msra.gmra.mxu1 %vm321_vm1, %v2562_v6  ;;  %2047 = vmatmul.mubr.msk.bf16.vlgmr.msra.gmra.mxu0 %vm321_vm1, %v2567_v39 }
 0x154   :  { %2055 = vmatpush3.bf16.msra.mxu1 %v2537_v29  ;;  %2034 = vmatprep.mubr.msk.bf16.mxu1 %vm321_vm1, %v2574_v40 }
 0x155   :  { %2056 = vmatprep.subr.bf16.mxu1 %v2539_v30  ;;  %2050 = vmatprep.mubr.msk.bf16.mxu0 %vm321_vm1, %v2580_v41 }
 0x156   :  { %2071 = vmatpush3.bf16.msra.mxu0 %v2231_v48 }
 0x157   :  { %2072 = vmatprep.subr.bf16.mxu0 %v2232_v49 }
 0x158   :  { %2057 = vmatpush3.bf16.msra.mxu1 %v2539_v30 }
 0x159   :  { %2058 = vmatprep.subr.bf16.mxu1 %v2547_v38 }
 0x15a   :  { %2073 = vmatpush3.bf16.msra.mxu0 %v2232_v49 }
 0x15b   :  { %2035 = vmatmul.mubr.msk.bf16.gmra.mxu1 %vm321_vm1, %v2595_v42  ;;  %2051 = vmatmul.mubr.msk.bf16.gmra.mxu0 %vm321_vm1, %v2600_v43 }
 0x15c   :  { %2059 = vmatpush3.bf16.msra.mxu1 %v2547_v38  ;;  %2062 = vmatprep.mubr.msk.bf16.mxu1 %vm321_vm1, %v2606_v44 }
 0x15d   :  { %2060 = vmatprep.subr.bf16.mxu1 %v2553_v5  ;;  %2074 = vmatprep.subr.bf16.mxu0 %v2233_v50 }
 0x15e   :  { %2075 = vmatpush3.bf16.msra.mxu0 %v2233_v50 }
 0x15f   :  { %2076 = vmatprep.subr.bf16.mxu0 %v2234_v51 }
 0x160   :  { %2061 = vmatpush3.bf16.msra.mxu1 %v2553_v5 }
 0x162   :  { %2077 = vmatpush3.bf16.msra.mxu0 %v2234_v51 }
 0x163   :  { %2063 = vmatmul.mubr.msk.bf16.vlgmr.msra.gmra.mxu1 %vm321_vm1, %v2620_v45  ;;  %2078 = vmatprep.subr.bf16.mxu0 %v2235_v52 }
 0x164   :  { %2066 = vmatprep.mubr.msk.bf16.mxu1 %vm321_vm1, %v2626_v46 }
 0x166   :  { %2079 = vmatpush3.bf16.msra.mxu0 %v2235_v52 }
 0x167   :  { %2080 = vmatprep.subr.bf16.mxu0 %v2236_v55 }
 0x16a   :  { %2081 = vmatpush3.bf16.msra.mxu0 %v2236_v55 }
 0x16b   :  { %2067 = vmatmul.mubr.msk.bf16.gmra.mxu1 %vm321_vm1, %v2635_v47  ;;  %2082 = vmatprep.subr.bf16.mxu0 %v2237_v60 }
 0x16e   :  { %2083 = vmatpush3.bf16.msra.mxu0 %v2237_v60 }
 0x16f   :  { %2084 = vmatprep.subr.bf16.mxu0 %v2238_v9 }
 0x172   :  { %2085 = vmatpush3.bf16.msra.mxu0 %v2238_v9 }
 0x213   :  { %v2032_v53 = vpop.f32.mrf.mxu1  ;;  %v2048_v54 = vpop.f32.mrf.mxu0 }
 0x215   :  { %v368_v56 = vpop.f32.mrf.mxu1  ;;  %v478_v57 = vpop.f32.mrf.mxu0 }
 0x217   :  { %v2033_v58 = vpop.f32.mrf.mxu1  ;;  %v2049_v59 = vpop.f32.mrf.mxu0 }
 0x218   :  { %v400_v61 = vpack.c.bf16 %v2033_v58, %v2032_v53  ;;  %v510_v62 = vpack.c.bf16 %v2049_v59, %v2048_v54 }
 0x219   :  { %v371_v63 = vpop.f32.mrf.mxu1  ;;  %v481_v0 = vpop.f32.mrf.mxu0 }
 0x21a   :  { %641 = vrot.lane.b32.xlu1 %v510_v62, %s2366_s11  ;;  %v509_v7 = vpack.c.bf16 %v481_v0, %v478_v57  ;;  %629 = vrot.lane.b32.xlu0 %v400_v61, %s2367_s12  ;;  %v399_v10 = vpack.c.bf16 %v371_v63, %v368_v56 }
 0x21b   :  { %v2036_v8 = vpop.f32.mrf.mxu1  ;;  %v2052_v15 = vpop.f32.mrf.mxu0 }
 0x21d   :  { %v384_v13 = vpop.f32.mrf.mxu1  ;;  %v494_v19 = vpop.f32.mrf.mxu0 }
 0x21e   :  { %639 = vrot.lane.b32.xlu1 %v509_v7, %s2366_s11  ;;  %627 = vrot.lane.b32.xlu0 %v399_v10, %s2367_s12 }
 0x21f   :  { %v2037_v14 = vpop.f32.mrf.mxu1  ;;  %v2053_v22 = vpop.f32.mrf.mxu0 }
 0x220   :  { %v402_v16 = vpack.c.bf16 %v2037_v14, %v2036_v8  ;;  %v512_v31 = vpack.c.bf16 %v2053_v22, %v2052_v15  ;;  %v1856_v8 = vld [vmem:[%s2884_s2 + $0x3] ss:$0 sm:$0xff] }
 0x221   :  { %v387_v17 = vpop.f32.mrf.mxu1  ;;  %v497_v27 = vpop.f32.mrf.mxu0 }
 0x222   :  { %v401_v18 = vpack.c.bf16 %v387_v17, %v384_v13  ;;  %633 = vrot.lane.b32.xlu1 %v402_v16, %s2367_s12  ;;  %v511_v33 = vpack.c.bf16 %v497_v27, %v494_v19 }
 0x223   :  { %v2064_v20 = vpop.f32.mrf.mxu1 }
 0x224   :  { %631 = vrot.lane.b32.xlu0 %v401_v18, %s2367_s12 }
 0x225   :  { %v588_v21 = vpop.f32.mrf.mxu1 }
 0x227   :  { %v2065_v23 = vpop.f32.mrf.mxu1 }
 0x228   :  { %v620_v24 = vpack.c.bf16 %v2065_v23, %v2064_v20 }
 0x229   :  { %v591_v25 = vpop.f32.mrf.mxu1 }
 0x22a   :  { %v619_v26 = vpack.c.bf16 %v591_v25, %v588_v21  ;;  %653 = vrot.lane.b32.xlu1 %v620_v24, %s2368_s4 }
 0x22b   :  { %v2068_v28 = vpop.f32.mrf.mxu1 }
 0x22c   :  { %651 = vrot.lane.b32.xlu0 %v619_v26, %s2368_s4 }
 0x22d   :  { %v604_v32 = vpop.f32.mrf.mxu1 }
 0x22e   :  { %645 = vrot.lane.b32.xlu1 %v512_v31, %s2366_s11 }
 0x22f   :  { %v2069_v34 = vpop.f32.mrf.mxu1 }
 0x230   :  { %v622_v35 = vpack.c.bf16 %v2069_v34, %v2068_v28  ;;  %643 = vrot.lane.b32.xlu0 %v511_v33, %s2366_s11 }
 0x231   :  { %v607_v36 = vpop.f32.mrf.mxu1 }
 0x232   :  { %v621_v37 = vpack.c.bf16 %v607_v36, %v604_v32  ;;  %657 = vrot.lane.b32.xlu1 %v622_v35, %s2368_s4 }
 0x234   :  { %655 = vrot.lane.b32.xlu0 %v621_v37, %s2368_s4 }
 0x28c   :  { %v642_v1 = vpop.permute.xlu1 %641  ;;  %v630_v2 = vpop.permute.xlu0 %629 }
 0x28d   :  { %v665_v51 = vsel %vm659_vm2, %v2547_v38, %v630_v2 }
 0x28e   :  { %v675_v55 = vsel %vm321_vm1, %v665_v51, %v642_v1 }
 0x290   :  { %v640_v3 = vpop.permute.xlu1 %639  ;;  %v628_v4 = vpop.permute.xlu0 %627 }
 0x291   :  { %v662_v50 = vsel %vm659_vm2, %v2553_v5, %v628_v4 }
 0x292   :  { %v673_v54 = vsel %vm321_vm1, %v662_v50, %v640_v3 }
 0x294   :  { %v634_v48 = vpop.permute.xlu1 %633 }
 0x295   :  { %v671_v38 = vsel %vm659_vm2, %v2537_v29, %v634_v48  ;;  %v2240_v29 = vld [vmem:[%s2887_s5] sm:$0xff]  }
 0x296   :  { %v632_v49 = vpop.permute.xlu0 %631 }
 0x297   :  { %v668_v5 = vsel %vm659_vm2, %v2539_v30, %v632_v49  ;;  %v2239_v30 = vld [vmem:[%s2887_s5 + $0x8] sm:$0xff]  }
 0x298   :  { %2094 = vmatprep.subr.bf16.mxu1 %v2239_v30 }
 0x299   :  { %2095 = vmatpush3.bf16.msra.mxu1 %v2239_v30 }
 0x29a   :  { %2096 = vmatprep.subr.bf16.mxu1 %v2240_v29 }
 0x29c   :  { %v654_v52 = vpop.permute.xlu1 %653 }
 0x29d   :  { %v685_v57 = vsel %vm680_vm3, %v675_v55, %v654_v52  ;;  %2097 = vmatpush3.bf16.msra.mxu1 %v2240_v29 }
 0x29e   :  { %v652_v53 = vpop.permute.xlu0 %651 }
 0x29f   :  { %v682_v56 = vsel %vm680_vm3, %v673_v54, %v652_v53 }
 0x2a0   :  { %v646_v58 = vpop.permute.xlu1 %645  ;;  %2086 = vmatprep.mubr.bf16.mxu0 %v682_v56 }
 0x2a1   :  { %2087 = vmatmul.mubr.bf16.vlgmr.msra.gmra.mxu0 %v685_v57  ;;  %v679_v63 = vsel %vm321_vm1, %v671_v38, %v646_v58 }
 0x2a2   :  { %v644_v59 = vpop.permute.xlu0 %643 }
 0x2a3   :  { %v677_v61 = vsel %vm321_vm1, %v668_v5, %v644_v59 }
 0x2a4   :  { %v658_v60 = vpop.permute.xlu1 %657 }
 0x2a5   :  { %v691_v7 = vsel %vm680_vm3, %v679_v63, %v658_v60 }
 0x2a6   :  { %v656_v62 = vpop.permute.xlu0 %655 }
 0x2a7   :  { %v688_v0 = vsel %vm680_vm3, %v677_v61, %v656_v62 }
 0x2a8   :  { %2090 = vmatprep.mubr.bf16.mxu0 %v688_v0 }
 0x2a9   :  { %2091 = vmatmul.mubr.bf16.gmra.mxu0 %v691_v7 }
 0x2aa   :  { %2130 = vmatprep.mubr.msk.bf16.mxu0 %vm321_vm1, %v2528_v12 }
 0x361   :  { %v2088_v9 = vpop.f32.mrf.mxu0 }
 0x362   :  { %v788_v10 = vadd.f32 %v2088_v9, %v1856_v8 }
 0x363   :  { %v779_v13 = vpop.f32.mrf.mxu0 }
 0x364   :  { %v780_v12 = vadd.f32 %v1856_v8, %v779_v13  ;;  %v820_v14 = vmul.f32 0.70710677, %v788_v10  ;;  %v812_v53 = vmul.f32 0.5, %v788_v10 }
 0x365   :  { %v2089_v15 = vpop.f32.mrf.mxu0 }
 0x366   :  { %v818_v16 = vmul.f32 0.70710677, %v780_v12  ;;  %v791_v17 = vadd.f32 %v2089_v15, %v1856_v8  ;;  %v810_v50 = vmul.f32 0.5, %v780_v12 }
 0x367   :  { %v782_v18 = vpop.f32.mrf.mxu0 }
 0x368   :  { %2272 = verf.f32 %v818_v16  ;;  %v821_v19 = vmul.f32 0.70710677, %v791_v17  ;;  %v783_v20 = vadd.f32 %v1856_v8, %v782_v18  ;;  %v813_v49 = vmul.f32 0.5, %v791_v17 }
 0x369   :  { %2274 = verf.f32 %v820_v14  ;;  %v2092_v21 = vpop.f32.mrf.mxu0 }
 0x36a   :  { %2276 = verf.f32 %v821_v19  ;;  %v819_v22 = vmul.f32 0.70710677, %v783_v20  ;;  %v804_v23 = vadd.f32 %v2092_v21, %v1856_v8  ;;  %v811_v51 = vmul.f32 0.5, %v783_v20  ;;  %v1865_v21 = vld [vmem:[%s2884_s2 + $0x4] ss:$0 sm:$0xff] }
 0x36b   :  { %v795_v24 = vpop.f32.mrf.mxu0 }
 0x36c   :  { %2278 = verf.f32 %v819_v22  ;;  %v796_v25 = vadd.f32 %v1856_v8, %v795_v24  ;;  %v824_v26 = vmul.f32 0.70710677, %v804_v23  ;;  %v816_v9 = vmul.f32 0.5, %v804_v23 }
 0x36d   :  { %v2093_v27 = vpop.f32.mrf.mxu0 }
 0x36e   :  { %v822_v28 = vmul.f32 0.70710677, %v796_v25  ;;  %v807_v31 = vadd.f32 %v2093_v27, %v1856_v8  ;;  %v814_v30 = vmul.f32 0.5, %v796_v25 }
 0x36f   :  { %v798_v32 = vpop.f32.mrf.mxu0 }
 0x370   :  { %2280 = verf.f32 %v822_v28  ;;  %v825_v33 = vmul.f32 0.70710677, %v807_v31  ;;  %v799_v34 = vadd.f32 %v1856_v8, %v798_v32  ;;  %v817_v7 = vmul.f32 0.5, %v807_v31 }
 0x371   :  { %2282 = verf.f32 %v824_v26 }
 0x372   :  { %2284 = verf.f32 %v825_v33  ;;  %v823_v35 = vmul.f32 0.70710677, %v799_v34  ;;  %v815_v29 = vmul.f32 0.5, %v799_v34 }
 0x374   :  { %2286 = verf.f32 %v823_v35 }
 0x375   :  { %v2273_v36 = vpop.eup %2272 }
 0x376   :  { %v2275_v37 = vpop.eup %2274  ;;  %v834_v2 = vadd.f32 1.0, %v2273_v36 }
 0x377   :  { %v2277_v1 = vpop.eup %2276  ;;  %v836_v48 = vadd.f32 1.0, %v2275_v37 }
 0x378   :  { %v837_v3 = vadd.f32 1.0, %v2277_v1  ;;  %v842_v55 = vmul.f32 %v834_v2, %v810_v50 }
 0x379   :  { %v2279_v4 = vpop.eup %2278  ;;  %v844_v58 = vmul.f32 %v836_v48, %v812_v53 }
 0x37a   :  { %v835_v52 = vadd.f32 1.0, %v2279_v4  ;;  %v845_v54 = vmul.f32 %v837_v3, %v813_v49 }
 0x37c   :  { %v843_v56 = vmul.f32 %v835_v52, %v811_v51  ;;  %v851_v38 = vpack.c.bf16 %v845_v54, %v844_v58 }
 0x37d   :  { %v2281_v57 = vpop.eup %2280 }
 0x37e   :  { %v2283_v59 = vpop.eup %2282  ;;  %v850_v5 = vpack.c.bf16 %v843_v56, %v842_v55  ;;  %v838_v61 = vadd.f32 1.0, %v2281_v57 }
 0x37f   :  { %v2285_v60 = vpop.eup %2284  ;;  %v840_v0 = vadd.f32 1.0, %v2283_v59 }
 0x380   :  { %v841_v62 = vadd.f32 1.0, %v2285_v60  ;;  %2098 = vmatprep.mubr.msk.bf16.mxu1 %vm659_vm2, %v850_v5  ;;  %v846_v13 = vmul.f32 %v838_v61, %v814_v30 }
 0x381   :  { %v2287_v63 = vpop.eup %2286  ;;  %2099 = vmatmul.mubr.msk.bf16.vlgmr.msra.gmra.mxu1 %vm659_vm2, %v851_v38  ;;  %v848_v14 = vmul.f32 %v840_v0, %v816_v9 }
 0x382   :  { %v839_v8 = vadd.f32 1.0, %v2287_v63  ;;  %v849_v10 = vmul.f32 %v841_v62, %v817_v7 }
 0x384   :  { %v847_v12 = vmul.f32 %v839_v8, %v815_v29  ;;  %v853_v16 = vpack.c.bf16 %v849_v10, %v848_v14 }
 0x386   :  { %v852_v15 = vpack.c.bf16 %v847_v12, %v846_v13 }
 0x388   :  { %2102 = vmatprep.mubr.msk.bf16.mxu1 %vm659_vm2, %v852_v15 }
 0x389   :  { %2103 = vmatmul.mubr.msk.bf16.gmra.mxu1 %vm659_vm2, %v853_v16 }
 0x38a   :  { %2114 = vmatprep.mubr.msk.bf16.mxu1 %vm321_vm1, %v2523_v11 }
 0x441   :  { %v2100_v17 = vpop.f32.mrf.mxu1 }
 0x442   :  { %v930_v25 = vadd.f32 %v2100_v17, %v1865_v21 }
 0x443   :  { %v921_v18 = vpop.f32.mrf.mxu1 }
 0x444   :  { %v962_v35 = vmul.f32 0.70710677, %v930_v25  ;;  %v922_v37 = vadd.f32 %v1865_v21, %v921_v18  ;;  %v954_v13 = vmul.f32 0.5, %v930_v25 }
 0x445   :  { %v2101_v19 = vpop.f32.mrf.mxu1 }
 0x446   :  { %v933_v22 = vadd.f32 %v2101_v19, %v1865_v21  ;;  %v960_v48 = vmul.f32 0.70710677, %v922_v37  ;;  %v952_v19 = vmul.f32 0.5, %v922_v37 }
 0x447   :  { %v924_v20 = vpop.f32.mrf.mxu1 }
 0x448   :  { %v963_v31 = vmul.f32 0.70710677, %v933_v22  ;;  %v925_v33 = vadd.f32 %v1865_v21, %v924_v20  ;;  %v955_v7 = vmul.f32 0.5, %v933_v22 }
 0x449   :  { %v2104_v23 = vpop.f32.mrf.mxu1 }
 0x44a   :  { %v946_v24 = vadd.f32 %v2104_v23, %v1865_v21  ;;  %v961_v3 = vmul.f32 0.70710677, %v925_v33  ;;  %v953_v18 = vmul.f32 0.5, %v925_v33 }
 0x44b   :  { %v937_v26 = vpop.f32.mrf.mxu1 }
 0x44c   :  { %v966_v27 = vmul.f32 0.70710677, %v946_v24  ;;  %v938_v28 = vadd.f32 %v1865_v21, %v937_v26  ;;  %v958_v55 = vmul.f32 0.5, %v946_v24  ;;  %v2247_v26 = vld [vmem:[%s2888_s6 + $0x8] sm:$0xff]  }
 0x44d   :  { %v2105_v32 = vpop.f32.mrf.mxu1 }
 0x44e   :  { %2288 = verf.f32 %v966_v27  ;;  %v964_v11 = vmul.f32 0.70710677, %v938_v28  ;;  %v949_v34 = vadd.f32 %v2105_v32, %v1865_v21  ;;  %v956_v5 = vmul.f32 0.5, %v938_v28 }
 0x44f   :  { %v940_v36 = vpop.f32.mrf.mxu1 }
 0x450   :  { %2290 = verf.f32 %v964_v11  ;;  %v967_v1 = vmul.f32 0.70710677, %v949_v34  ;;  %v941_v2 = vadd.f32 %v1865_v21, %v940_v36  ;;  %v959_v57 = vmul.f32 0.5, %v949_v34  ;;  %v2248_v34 = vld [vmem:[%s2888_s6] sm:$0xff]  }
 0x451   :  { %2292 = verf.f32 %v963_v31 }
 0x452   :  { %2294 = verf.f32 %v967_v1  ;;  %v965_v4 = vmul.f32 0.70710677, %v941_v2  ;;  %v957_v60 = vmul.f32 0.5, %v941_v2 }
 0x453   :  { %2296 = verf.f32 %v962_v35 }
 0x454   :  { %2298 = verf.f32 %v965_v4 }
 0x455   :  { %2300 = verf.f32 %v961_v3 }
 0x456   :  { %2302 = verf.f32 %v960_v48 }
 0x45b   :  { %v2289_v49 = vpop.eup %2288 }
 0x45c   :  { %v982_v52 = vadd.f32 1.0, %v2289_v49 }
 0x45d   :  { %v2291_v50 = vpop.eup %2290 }
 0x45e   :  { %v2293_v51 = vpop.eup %2292  ;;  %v980_v56 = vadd.f32 1.0, %v2291_v50  ;;  %v990_v61 = vmul.f32 %v982_v52, %v958_v55 }
 0x45f   :  { %v2295_v53 = vpop.eup %2294  ;;  %v979_v38 = vadd.f32 1.0, %v2293_v51 }
 0x460   :  { %v2297_v54 = vpop.eup %2296  ;;  %v983_v58 = vadd.f32 1.0, %v2295_v53  ;;  %v988_v29 = vmul.f32 %v980_v56, %v956_v5 }
 0x461   :  { %v2299_v59 = vpop.eup %2298  ;;  %v978_v30 = vadd.f32 1.0, %v2297_v54  ;;  %v987_v12 = vmul.f32 %v979_v38, %v955_v7 }
 0x462   :  { %v991_v62 = vmul.f32 %v983_v58, %v959_v57  ;;  %v981_v63 = vadd.f32 1.0, %v2299_v59  ;;  %v2301_v0 = vpop.eup %2300 }
 0x463   :  { %v2303_v10 = vpop.eup %2302  ;;  %v977_v14 = vadd.f32 1.0, %v2301_v0  ;;  %v986_v16 = vmul.f32 %v978_v30, %v954_v13 }
 0x464   :  { %v2711_v8 = vpack.c.bf16 %v991_v62, %v990_v61  ;;  %v989_v9 = vmul.f32 %v981_v63, %v957_v60  ;;  %v976_v17 = vadd.f32 1.0, %v2303_v10 }
 0x465   :  { %v2721_v20 = vpack.c.bf16 %v987_v12, %v986_v16  ;;  %v985_v21 = vmul.f32 %v977_v14, %v953_v18 }
 0x466   :  { %v2713_v15 = vpack.c.bf16 %v989_v9, %v988_v29  ;;  %2106 = vmatprep.subr.bf16.mxu1 %v2711_v8  ;;  %2122 = vmatprep.subr.bf16.mxu0 %v2711_v8  ;;  %v984_v22 = vmul.f32 %v976_v17, %v952_v19 }
 0x467   :  { %2107 = vmatpush3.bf16.msra.mxu1 %v2711_v8  ;;  %2123 = vmatpush3.bf16.msra.mxu0 %v2711_v8 }
 0x468   :  { %2108 = vmatprep.subr.bf16.mxu1 %v2713_v15  ;;  %2124 = vmatprep.subr.bf16.mxu0 %v2713_v15  ;;  %v2727_v23 = vpack.c.bf16 %v985_v21, %v984_v22 }
 0x46b   :  { %2109 = vmatpush3.bf16.msra.mxu1 %v2713_v15  ;;  %2125 = vmatpush3.bf16.msra.mxu0 %v2713_v15 }
 0x46c   :  { %2110 = vmatprep.subr.bf16.mxu1 %v2721_v20  ;;  %2126 = vmatprep.subr.bf16.mxu0 %v2721_v20 }
 0x46f   :  { %2111 = vmatpush3.bf16.msra.mxu1 %v2721_v20  ;;  %2127 = vmatpush3.bf16.msra.mxu0 %v2721_v20 }
 0x470   :  { %2112 = vmatprep.subr.bf16.mxu1 %v2727_v23  ;;  %2128 = vmatprep.subr.bf16.mxu0 %v2727_v23 }
 0x473   :  { %2113 = vmatpush3.bf16.msra.mxu1 %v2727_v23  ;;  %2129 = vmatpush3.bf16.msra.mxu0 %v2727_v23 }
 0x474   :  { %2138 = vmatprep.subr.bf16.mxu1 %v2711_v8 }
 0x476   :  { %2115 = vmatmul.mubr.msk.bf16.vlgmr.msra.gmra.mxu1 %vm321_vm1, %v2562_v6  ;;  %2131 = vmatmul.mubr.msk.bf16.vlgmr.msra.gmra.mxu0 %vm321_vm1, %v2567_v39  ;;  %v2241_v6 = vld [vmem:[%s2888_s6 + $0x38] sm:$0xff]   ;;  %v2242_v39 = vld [vmem:[%s2888_s6 + $0x30] sm:$0xff]  }
 0x477   :  { %2139 = vmatpush3.bf16.msra.mxu1 %v2711_v8  ;;  %2118 = vmatprep.mubr.msk.bf16.mxu1 %vm321_vm1, %v2574_v40  ;;  %v2243_v40 = vld [vmem:[%s2888_s6 + $0x28] sm:$0xff]  }
 0x478   :  { %2140 = vmatprep.subr.bf16.mxu1 %v2713_v15  ;;  %2134 = vmatprep.mubr.msk.bf16.mxu0 %vm321_vm1, %v2580_v41  ;;  %v2244_v41 = vld [vmem:[%s2888_s6 + $0x20] sm:$0xff]  }
 0x479   :  { %2154 = vmatprep.subr.bf16.mxu0 %v2241_v6 }
 0x47a   :  { %2155 = vmatpush3.bf16.msra.mxu0 %v2241_v6 }
 0x47b   :  { %2141 = vmatpush3.bf16.msra.mxu1 %v2713_v15  ;;  %2156 = vmatprep.subr.bf16.mxu0 %v2242_v39 }
 0x47c   :  { %2142 = vmatprep.subr.bf16.mxu1 %v2721_v20 }
 0x47e   :  { %2119 = vmatmul.mubr.msk.bf16.gmra.mxu1 %vm321_vm1, %v2595_v42  ;;  %2135 = vmatmul.mubr.msk.bf16.gmra.mxu0 %vm321_vm1, %v2600_v43  ;;  %v2245_v42 = vld [vmem:[%s2888_s6 + $0x18] sm:$0xff]  }
 0x47f   :  { %2143 = vmatpush3.bf16.msra.mxu1 %v2721_v20  ;;  %2146 = vmatprep.mubr.msk.bf16.mxu1 %vm321_vm1, %v2606_v44 }
 0x480   :  { %2144 = vmatprep.subr.bf16.mxu1 %v2727_v23  ;;  %2157 = vmatpush3.bf16.msra.mxu0 %v2242_v39 }
 0x481   :  { %2158 = vmatprep.subr.bf16.mxu0 %v2243_v40 }
 0x483   :  { %2145 = vmatpush3.bf16.msra.mxu1 %v2727_v23 }
 0x484   :  { %2159 = vmatpush3.bf16.msra.mxu0 %v2243_v40 }
 0x485   :  { %2160 = vmatprep.subr.bf16.mxu0 %v2244_v41 }
 0x486   :  { %2147 = vmatmul.mubr.msk.bf16.vlgmr.msra.gmra.mxu1 %vm321_vm1, %v2620_v45  ;;  %v2246_v45 = vld [vmem:[%s2888_s6 + $0x10] sm:$0xff]  }
 0x487   :  { %2150 = vmatprep.mubr.msk.bf16.mxu1 %vm321_vm1, %v2626_v46 }
 0x488   :  { %2161 = vmatpush3.bf16.msra.mxu0 %v2244_v41 }
 0x489   :  { %2162 = vmatprep.subr.bf16.mxu0 %v2245_v42 }
 0x48c   :  { %2163 = vmatpush3.bf16.msra.mxu0 %v2245_v42 }
 0x48d   :  { %2164 = vmatprep.subr.bf16.mxu0 %v2246_v45 }
 0x48e   :  { %2151 = vmatmul.mubr.msk.bf16.gmra.mxu1 %vm321_vm1, %v2635_v47 }
 0x490   :  { %2165 = vmatpush3.bf16.msra.mxu0 %v2246_v45  ;;  %v1884_v45 = vld [vmem:[%s2884_s2 + $0x5] ss:$0 sm:$0xff] }
 0x491   :  { %2166 = vmatprep.subr.bf16.mxu0 %v2247_v26 }
 0x494   :  { %2167 = vmatpush3.bf16.msra.mxu0 %v2247_v26 }
 0x495   :  { %2168 = vmatprep.subr.bf16.mxu0 %v2248_v34 }
 0x498   :  { %2169 = vmatpush3.bf16.msra.mxu0 %v2248_v34 }
 0x536   :  { %v2116_v43 = vpop.f32.mrf.mxu1  ;;  %v2132_v44 = vpop.f32.mrf.mxu0 }
 0x538   :  { %v1047_v46 = vpop.f32.mrf.mxu1  ;;  %v1116_v47 = vpop.f32.mrf.mxu0 }
 0x53a   :  { %v2117_v24 = vpop.f32.mrf.mxu1  ;;  %v2133_v25 = vpop.f32.mrf.mxu0 }
 0x53b   :  { %v1079_v27 = vpack.c.bf16 %v2117_v24, %v2116_v43  ;;  %v1148_v32 = vpack.c.bf16 %v2133_v25, %v2132_v44  ;;  %v2249_v44 = vld [vmem:[%s2890_s8 + $0x8] sm:$0xff]  }
 0x53c   :  { %v1050_v28 = vpop.f32.mrf.mxu1  ;;  %v1119_v11 = vpop.f32.mrf.mxu0  ;;  %2178 = vmatprep.subr.bf16.mxu1 %v2249_v44 }
 0x53d   :  { %v1078_v31 = vpack.c.bf16 %v1050_v28, %v1047_v46  ;;  %1226 = vrot.lane.b32.xlu1 %v1079_v27, %s2367_s12  ;;  %v1147_v36 = vpack.c.bf16 %v1119_v11, %v1116_v47  ;;  %2179 = vmatpush3.bf16.msra.mxu1 %v2249_v44  ;;  %v2337_v44 = vld [vmem:[%s2882_s0 + $0x8] sm:$0xff] }
 0x53e   :  { %v2120_v33 = vpop.f32.mrf.mxu1  ;;  %v2136_v1 = vpop.f32.mrf.mxu0 }
 0x53f   :  { %1224 = vrot.lane.b32.xlu0 %v1078_v31, %s2367_s12 }
 0x540   :  { %v1063_v35 = vpop.f32.mrf.mxu1  ;;  %v1132_v49 = vpop.f32.mrf.mxu0 }
 0x541   :  { %1238 = vrot.lane.b32.xlu1 %v1148_v32, %s2366_s11 }
 0x542   :  { %v2121_v37 = vpop.f32.mrf.mxu1  ;;  %v2137_v51 = vpop.f32.mrf.mxu0 }
 0x543   :  { %v1081_v2 = vpack.c.bf16 %v2121_v37, %v2120_v33  ;;  %1236 = vrot.lane.b32.xlu0 %v1147_v36, %s2366_s11  ;;  %v1150_v58 = vpack.c.bf16 %v2137_v51, %v2136_v1 }
 0x544   :  { %v1066_v3 = vpop.f32.mrf.mxu1  ;;  %v1135_v56 = vpop.f32.mrf.mxu0 }
 0x545   :  { %v1080_v4 = vpack.c.bf16 %v1066_v3, %v1063_v35  ;;  %1230 = vrot.lane.b32.xlu1 %v1081_v2, %s2367_s12  ;;  %v1149_v5 = vpack.c.bf16 %v1135_v56, %v1132_v49 }
 0x546   :  { %v2148_v48 = vpop.f32.mrf.mxu1 }
 0x547   :  { %1228 = vrot.lane.b32.xlu0 %v1080_v4, %s2367_s12 }
 0x548   :  { %v1185_v50 = vpop.f32.mrf.mxu1 }
 0x54a   :  { %v2149_v52 = vpop.f32.mrf.mxu1 }
 0x54b   :  { %v1217_v53 = vpack.c.bf16 %v2149_v52, %v2148_v48 }
 0x54c   :  { %v1188_v54 = vpop.f32.mrf.mxu1 }
 0x54d   :  { %v1216_v55 = vpack.c.bf16 %v1188_v54, %v1185_v50  ;;  %1250 = vrot.lane.b32.xlu1 %v1217_v53, %s2368_s4 }
 0x54e   :  { %v2152_v57 = vpop.f32.mrf.mxu1 }
 0x54f   :  { %1248 = vrot.lane.b32.xlu0 %v1216_v55, %s2368_s4 }
 0x550   :  { %v1201_v59 = vpop.f32.mrf.mxu1 }
 0x551   :  { %1242 = vrot.lane.b32.xlu1 %v1150_v58, %s2366_s11 }
 0x552   :  { %v2153_v60 = vpop.f32.mrf.mxu1 }
 0x553   :  { %v1219_v38 = vpack.c.bf16 %v2153_v60, %v2152_v57  ;;  %1240 = vrot.lane.b32.xlu0 %v1149_v5, %s2366_s11 }
 0x554   :  { %v1204_v61 = vpop.f32.mrf.mxu1 }
 0x555   :  { %v1218_v62 = vpack.c.bf16 %v1204_v61, %v1201_v59  ;;  %1254 = vrot.lane.b32.xlu1 %v1219_v38, %s2368_s4 }
 0x557   :  { %1252 = vrot.lane.b32.xlu0 %v1218_v62, %s2368_s4  ;;  %s2369_s4 = smov [#allocation2]  }
 0x558   :  { %s1799_s18 = sshll.u32 %s2369_s4, 4  ;;  %s1800_s18 = int_to_ptr.vmem [resolvable:$true] %s1799_s18 }
 0x559   :  { %p2349_p1 = scmp.lt.s32.totalorder %s1800_s18, %s1800_s18 }
 0x5af   :  { %v1227_v63 = vpop.permute.xlu1 %1226 }
 0x5b0   :  { %v1261_v12 = vsel %vm659_vm2, %v2721_v20, %v1227_v63 }
 0x5b1   :  { %v1225_v0 = vpop.permute.xlu0 %1224 }
 0x5b2   :  { %v1258_v13 = vsel %vm659_vm2, %v2727_v23, %v1225_v0 }
 0x5b3   :  { %v1239_v7 = vpop.permute.xlu1 %1238 }
 0x5b4   :  { %v1271_v17 = vsel %vm321_vm1, %v1261_v12, %v1239_v7 }
 0x5b5   :  { %v1237_v30 = vpop.permute.xlu0 %1236 }
 0x5b6   :  { %v1269_v14 = vsel %vm321_vm1, %v1258_v13, %v1237_v30 }
 0x5b7   :  { %v1231_v29 = vpop.permute.xlu1 %1230 }
 0x5b8   :  { %v1267_v20 = vsel %vm659_vm2, %v2711_v8, %v1231_v29  ;;  %v2250_v8 = vld [vmem:[%s2890_s8] sm:$0xff]  }
 0x5b9   :  { %v1229_v9 = vpop.permute.xlu0 %1228  ;;  %2180 = vmatprep.subr.bf16.mxu1 %v2250_v8 }
 0x5ba   :  { %v1264_v6 = vsel %vm659_vm2, %v2713_v15, %v1229_v9  ;;  %2181 = vmatpush3.bf16.msra.mxu1 %v2250_v8  ;;  %v2824_v15 = vld [vmem:[%s2889_s7] sm:$0xff]  }
 0x5bb   :  { %2190 = vmatprep.subr.bf16.mxu1 %v2824_v15 }
 0x5bf   :  { %v1251_v10 = vpop.permute.xlu1 %1250 }
 0x5c0   :  { %v1280_v19 = vsel %vm680_vm3, %v1271_v17, %v1251_v10 }
 0x5c1   :  { %v1249_v16 = vpop.permute.xlu0 %1248 }
 0x5c2   :  { %v1277_v18 = vsel %vm680_vm3, %v1269_v14, %v1249_v16 }
 0x5c3   :  { %v1243_v21 = vpop.permute.xlu1 %1242  ;;  %2170 = vmatprep.mubr.bf16.mxu0 %v1277_v18 }
 0x5c4   :  { %2171 = vmatmul.mubr.bf16.vlgmr.msra.gmra.mxu0 %v1280_v19  ;;  %v1275_v41 = vsel %vm321_vm1, %v1267_v20, %v1243_v21 }
 0x5c5   :  { %v1241_v22 = vpop.permute.xlu0 %1240 }
 0x5c6   :  { %v1273_v39 = vsel %vm321_vm1, %v1264_v6, %v1241_v22 }
 0x5c7   :  { %v1255_v23 = vpop.permute.xlu1 %1254 }
 0x5c8   :  { %v1286_v43 = vsel %vm680_vm3, %v1275_v41, %v1255_v23 }
 0x5c9   :  { %v1253_v40 = vpop.permute.xlu0 %1252 }
 0x5ca   :  { %v1283_v42 = vsel %vm680_vm3, %v1273_v39, %v1253_v40 }
 0x5cb   :  { %2174 = vmatprep.mubr.bf16.mxu0 %v1283_v42 }
 0x5cc   :  { %2175 = vmatmul.mubr.bf16.gmra.mxu0 %v1286_v43  ;;  %v2336_v43 = vld [vmem:[%s2882_s0] sm:$0xff] }
 0x5cd   :  { %v1445_v8 = vpack.c.bf16 %v2337_v44, %v2336_v43 }
 0x684   :  { %v2172_v46 = vpop.f32.mrf.mxu0 }
 0x685   :  { %v1383_v47 = vadd.f32 %v2172_v46, %v1884_v45  ;;  %v2339_v46 = vld [vmem:[%s2882_s0 + $0x18] sm:$0xff] }
 0x686   :  { %v1374_v24 = vpop.f32.mrf.mxu0 }
 0x687   :  { %v1375_v25 = vadd.f32 %v1884_v45, %v1374_v24  ;;  %v1415_v26 = vmul.f32 0.70710677, %v1383_v47  ;;  %v1407_v62 = vmul.f32 0.5, %v1383_v47  ;;  %v2340_v24 = vld [vmem:[%s2882_s0 + $0x20] sm:$0xff] }
 0x688   :  { %v2173_v27 = vpop.f32.mrf.mxu0 }
 0x689   :  { %v1413_v28 = vmul.f32 0.70710677, %v1375_v25  ;;  %v1386_v31 = vadd.f32 %v2173_v27, %v1884_v45  ;;  %v1405_v60 = vmul.f32 0.5, %v1375_v25  ;;  %v2341_v25 = vld [vmem:[%s2882_s0 + $0x28] sm:$0xff]  ;;  %v2342_v27 = vld [vmem:[%s2882_s0 + $0x30] sm:$0xff] }
 0x68a   :  { %v1377_v32 = vpop.f32.mrf.mxu0 }
 0x68b   :  { %2304 = verf.f32 %v1413_v28  ;;  %v1416_v33 = vmul.f32 0.70710677, %v1386_v31  ;;  %v1378_v11 = vadd.f32 %v1884_v45, %v1377_v32  ;;  %v1408_v5 = vmul.f32 0.5, %v1386_v31  ;;  %v2343_v28 = vld [vmem:[%s2882_s0 + $0x38] sm:$0xff]  ;;  %v2252_v32 = vld [vmem:[%s2891_s9 + $0x8] sm:$0xff]  }
 0x68c   :  { %2306 = verf.f32 %v1415_v26  ;;  %v2176_v34 = vpop.f32.mrf.mxu0  ;;  %v1447_v26 = vpack.c.bf16 %v2341_v25, %v2340_v24  ;;  %v1448_v31 = vpack.c.bf16 %v2343_v28, %v2342_v27  ;;  %2200 = vmatprep.subr.bf16.mxu0 %v2252_v32 }
 0x68d   :  { %2308 = verf.f32 %v1416_v33  ;;  %v1414_v35 = vmul.f32 0.70710677, %v1378_v11  ;;  %v1399_v36 = vadd.f32 %v2176_v34, %v1884_v45  ;;  %v1406_v38 = vmul.f32 0.5, %v1378_v11  ;;  %2201 = vmatpush3.bf16.msra.mxu0 %v2252_v32  ;;  %v2253_v33 = vld [vmem:[%s2891_s9] sm:$0xff]  }
 0x68e   :  { %v1390_v37 = vpop.f32.mrf.mxu0  ;;  %2202 = vmatprep.subr.bf16.mxu0 %v2253_v33 }
 0x68f   :  { %2310 = verf.f32 %v1414_v35  ;;  %v1391_v1 = vadd.f32 %v1884_v45, %v1390_v37  ;;  %v1419_v2 = vmul.f32 0.70710677, %v1399_v36  ;;  %v1411_v23 = vmul.f32 0.5, %v1399_v36 }
 0x690   :  { %v2177_v3 = vpop.f32.mrf.mxu0 }
 0x691   :  { %v1417_v4 = vmul.f32 0.70710677, %v1391_v1  ;;  %v1402_v48 = vadd.f32 %v2177_v3, %v1884_v45  ;;  %v1409_v21 = vmul.f32 0.5, %v1391_v1  ;;  %2203 = vmatpush3.bf16.msra.mxu0 %v2253_v33 }
 0x692   :  { %v1393_v49 = vpop.f32.mrf.mxu0 }
 0x693   :  { %2312 = verf.f32 %v1417_v4  ;;  %v1420_v50 = vmul.f32 0.70710677, %v1402_v48  ;;  %v1394_v51 = vadd.f32 %v1884_v45, %v1393_v49  ;;  %v1412_v19 = vmul.f32 0.5, %v1402_v48  ;;  %v1904_v48 = vld [vmem:[%s2884_s2 + $0x6] ss:$0 sm:$0xff] }
 0x694   :  { %2314 = verf.f32 %v1419_v2 }
 0x695   :  { %2316 = verf.f32 %v1420_v50  ;;  %v1418_v52 = vmul.f32 0.70710677, %v1394_v51  ;;  %v1410_v22 = vmul.f32 0.5, %v1394_v51 }
 0x697   :  { %2318 = verf.f32 %v1418_v52 }
 0x698   :  { %v2305_v53 = vpop.eup %2304 }
 0x699   :  { %v2307_v54 = vpop.eup %2306  ;;  %v1429_v56 = vadd.f32 1.0, %v2305_v53 }
 0x69a   :  { %v2309_v55 = vpop.eup %2308  ;;  %v1431_v59 = vadd.f32 1.0, %v2307_v54 }
 0x69b   :  { %v1432_v57 = vadd.f32 1.0, %v2309_v55  ;;  %v1437_v0 = vmul.f32 %v1429_v56, %v1405_v60 }
 0x69c   :  { %v2311_v58 = vpop.eup %2310  ;;  %v1439_v29 = vmul.f32 %v1431_v59, %v1407_v62 }
 0x69d   :  { %v1430_v61 = vadd.f32 1.0, %v2311_v58  ;;  %v1440_v63 = vmul.f32 %v1432_v57, %v1408_v5 }
 0x69f   :  { %v1438_v7 = vmul.f32 %v1430_v61, %v1406_v38  ;;  %v1452_v12 = vpack.c.bf16 %v1440_v63, %v1439_v29 }
 0x6a0   :  { %v2313_v30 = vpop.eup %2312 }
 0x6a1   :  { %v2315_v9 = vpop.eup %2314  ;;  %v1451_v10 = vpack.c.bf16 %v1438_v7, %v1437_v0  ;;  %v1433_v14 = vadd.f32 1.0, %v2313_v30 }
 0x6a2   :  { %v2317_v13 = vpop.eup %2316  ;;  %v1435_v18 = vadd.f32 1.0, %v2315_v9 }
 0x6a3   :  { %v1436_v16 = vadd.f32 1.0, %v2317_v13  ;;  %2182 = vmatprep.mubr.msk.bf16.mxu1 %vm659_vm2, %v1451_v10  ;;  %v1441_v39 = vmul.f32 %v1433_v14, %v1409_v21 }
 0x6a4   :  { %v2319_v17 = vpop.eup %2318  ;;  %2183 = vmatmul.mubr.msk.bf16.vlgmr.msra.gmra.mxu1 %vm659_vm2, %v1452_v12  ;;  %v1443_v41 = vmul.f32 %v1435_v18, %v1411_v23 }
 0x6a5   :  { %v1434_v6 = vadd.f32 1.0, %v2319_v17  ;;  %2191 = vmatpush3.bf16.msra.mxu1 %v2824_v15  ;;  %v1444_v20 = vmul.f32 %v1436_v16, %v1412_v19  ;;  %v2338_v15 = vld [vmem:[%s2882_s0 + $0x10] sm:$0xff] }
 0x6a6   :  { %v1446_v47 = vpack.c.bf16 %v2339_v46, %v2338_v15 }
 0x6a7   :  { %v1442_v40 = vmul.f32 %v1434_v6, %v1410_v22  ;;  %v1454_v45 = vpack.c.bf16 %v1444_v20, %v1443_v41 }
 0x6a9   :  { %v1453_v42 = vpack.c.bf16 %v1442_v40, %v1441_v39 }
 0x6ab   :  { %2186 = vmatprep.mubr.msk.bf16.mxu1 %vm659_vm2, %v1453_v42 }
 0x6ac   :  { %2187 = vmatmul.mubr.msk.bf16.gmra.mxu1 %vm659_vm2, %v1454_v45 }
 0x6ad   :  { %2192 = vmatprep.mubr.msk.bf16.mxu1 %vm45_vm0, %v1445_v8 }
 0x6b4   :  { %2193 = vmatmul.mubr.msk.bf16.vlgmr.msra.gmra.mxu1 %vm45_vm0, %v1446_v47 }
 0x6b5   :  { %2196 = vmatprep.mubr.msk.bf16.mxu1 %vm45_vm0, %v1447_v26 }
 0x6bc   :  { %2197 = vmatmul.mubr.msk.bf16.gmra.mxu1 %vm45_vm0, %v1448_v31 }
 0x764   :  { %v2184_v11 = vpop.f32.mrf.mxu1 }
 0x766   :  { %v1517_v34 = vpop.f32.mrf.mxu1 }
 0x768   :  { %v2185_v35 = vpop.f32.mrf.mxu1 }
 0x76a   :  { %v1520_v36 = vpop.f32.mrf.mxu1 }
 0x76c   :  { %v2188_v37 = vpop.f32.mrf.mxu1 }
 0x76e   :  { %v1533_v1 = vpop.f32.mrf.mxu1 }
 0x770   :  { %v2189_v2 = vpop.f32.mrf.mxu1 }
 0x772   :  { %v1536_v3 = vpop.f32.mrf.mxu1 }
 0x774   :  { %v2194_v4 = vpop.f32.mrf.mxu1 }
 0x775   :  { %v1609_v49 = vadd.f32 %v2194_v4, %v2184_v11 }
 0x776   :  { %v1600_v50 = vpop.f32.mrf.mxu1 }
 0x777   :  { %v1638_v51 = vadd.f32 %v1904_v48, %v1609_v49  ;;  %v1601_v52 = vadd.f32 %v1600_v50, %v1517_v34 }
 0x778   :  { %v2195_v53 = vpop.f32.mrf.mxu1 }
 0x779   :  { %v1654_v54 = vmul.f32 0.70710677, %v1638_v51  ;;  %v1636_v55 = vadd.f32 %v1904_v48, %v1601_v52  ;;  %v1612_v56 = vadd.f32 %v2195_v53, %v2185_v35  ;;  %v1646_v45 = vmul.f32 0.5, %v1638_v51  ;;  %v1905_v52 = vld [vmem:[%s2884_s2 + $0x7] ss:$0 sm:$0xff]  ;;  %s2344_s2 = scalar_lea.vmem %s1800_s18, 1024 }
 0x77a   :  { %v1603_v57 = vpop.f32.mrf.mxu1  ;;  %p2345_p0 = scmp.ne.s32.totalorder %s1800_s18, %s2344_s2  ;;  %p2350_p2 = scmp.lt.s32.totalorder %s2344_s2, %s2344_s2 }
 0x77b   :  { %v1652_v58 = vmul.f32 0.70710677, %v1636_v55  ;;  %v1639_v59 = vadd.f32 %v1904_v48, %v1612_v56  ;;  %v1604_v5 = vadd.f32 %v1603_v57, %v1520_v36  ;;  %2320 = verf.f32 %v1654_v54 }
 0x77c   :  { %v2198_v60 = vpop.f32.mrf.mxu1  ;;  %v1644_v43 = vmul.f32 0.5, %v1636_v55  ;;  %p2351_p3 = por %p2350_p2, %p2349_p1 }
 0x77d   :  { %v1655_v38 = vmul.f32 0.70710677, %v1639_v59  ;;  %v1625_v61 = vadd.f32 %v2198_v60, %v2188_v37  ;;  %2322 = verf.f32 %v1652_v58  ;;  %v1637_v62 = vadd.f32 %v1904_v48, %v1604_v5 }
 0x77e   :  { %v1616_v63 = vpop.f32.mrf.mxu1  ;;  %v1647_v42 = vmul.f32 0.5, %v1639_v59  ;;  %p2352_p4 = pnand %p2351_p3, %p2345_p0 }
 0x77f   :  { %2324 = verf.f32 %v1655_v38  ;;  %v1642_v0 = vadd.f32 %v1904_v48, %v1625_v61  ;;  %v1617_v7 = vadd.f32 %v1616_v63, %v1533_v1  ;;  %v1653_v30 = vmul.f32 0.70710677, %v1637_v62 }
 0x780   :  { %v2199_v29 = vpop.f32.mrf.mxu1  ;;  %v1645_v44 = vmul.f32 0.5, %v1637_v62 }
 0x781   :  { %v1658_v9 = vmul.f32 0.70710677, %v1642_v0  ;;  %v1640_v10 = vadd.f32 %v1904_v48, %v1617_v7  ;;  %v1628_v13 = vadd.f32 %v2199_v29, %v2189_v2  ;;  %2326 = verf.f32 %v1653_v30 }
 0x782   :  { %v1619_v12 = vpop.f32.mrf.mxu1  ;;  %v1650_v2 = vmul.f32 0.5, %v1642_v0 }
 0x783   :  { %v1656_v14 = vmul.f32 0.70710677, %v1640_v10  ;;  %v1643_v16 = vadd.f32 %v1904_v48, %v1628_v13  ;;  %v1620_v17 = vadd.f32 %v1619_v12, %v1536_v3  ;;  %2328 = verf.f32 %v1658_v9 }
 0x784   :  { %v1648_v36 = vmul.f32 0.5, %v1640_v10 }
 0x785   :  { %v1659_v18 = vmul.f32 0.70710677, %v1643_v16  ;;  %2330 = verf.f32 %v1656_v14  ;;  %v1641_v19 = vadd.f32 %v1904_v48, %v1620_v17  ;;  %v1651_v35 = vmul.f32 0.5, %v1643_v16 }
 0x787   :  { %2332 = verf.f32 %v1659_v18  ;;  %v1657_v21 = vmul.f32 0.70710677, %v1641_v19  ;;  %v1649_v37 = vmul.f32 0.5, %v1641_v19 }
 0x788   :  { %v2321_v22 = vpop.eup %2320 }
 0x789   :  { %2334 = verf.f32 %v1657_v21  ;;  %v1670_v41 = vadd.f32 1.0, %v2321_v22 }
 0x78a   :  { %v2323_v6 = vpop.eup %2322 }
 0x78b   :  { %v1668_v39 = vadd.f32 1.0, %v2323_v6  ;;  %v1678_v26 = vmul.f32 %v1670_v41, %v1646_v45 }
 0x78c   :  { %v2325_v23 = vpop.eup %2324 }
 0x78d   :  { %v1671_v20 = vadd.f32 1.0, %v2325_v23  ;;  %v1676_v47 = vmul.f32 %v1668_v39, %v1644_v43 }
 0x78e   :  { %v2327_v40 = vpop.eup %2326 }
 0x78f   :  { %v1669_v8 = vadd.f32 1.0, %v2327_v40  ;;  %v1679_v15 = vmul.f32 %v1671_v20, %v1647_v42 }
 0x790   :  { %v2329_v46 = vpop.eup %2328 }
 0x791   :  { %v1677_v24 = vmul.f32 %v1669_v8, %v1645_v44  ;;  %v1685_v31 = vpack.c.bf16 %v1679_v15, %v1678_v26  ;;  %v1674_v34 = vadd.f32 1.0, %v2329_v46 }
 0x792   :  { %v2331_v25 = vpop.eup %2330 }
 0x793   :  { %v1684_v28 = vpack.c.bf16 %v1677_v24, %v1676_v47  ;;  %v1672_v33 = vadd.f32 1.0, %v2331_v25  ;;  %v1682_v49 = vmul.f32 %v1674_v34, %v1650_v2 }
 0x794   :  { %v2333_v27 = vpop.eup %2332 }
 0x795   :  { %v1675_v32 = vadd.f32 1.0, %v2333_v27  ;;  %2204 = vmatprep.mubr.msk.bf16.mxu0 %vm659_vm2, %v1684_v28  ;;  %v1680_v4 = vmul.f32 %v1672_v33, %v1648_v36 }
 0x796   :  { %v2335_v11 = vpop.eup %2334  ;;  %2205 = vmatmul.mubr.msk.bf16.vlgmr.msra.gmra.mxu0 %vm659_vm2, %v1685_v31 }
 0x797   :  { %v1673_v1 = vadd.f32 1.0, %v2335_v11  ;;  %v1683_v3 = vmul.f32 %v1675_v32, %v1651_v35 }
 0x799   :  { %v1681_v48 = vmul.f32 %v1673_v1, %v1649_v37  ;;  %v1687_v51 = vpack.c.bf16 %v1683_v3, %v1682_v49 }
 0x79b   :  { %v1686_v50 = vpack.c.bf16 %v1681_v48, %v1680_v4 }
 0x79d   :  { %2208 = vmatprep.mubr.msk.bf16.mxu0 %vm659_vm2, %v1686_v50 }
 0x79e   :  { %2209 = vmatmul.mubr.msk.bf16.gmra.mxu0 %vm659_vm2, %v1687_v51 }
 0x856   :  { %v2206_v53 = vpop.f32.mrf.mxu0 }
 0x857   :  { %v1764_v54 = vadd.f32 %v2206_v53, %v1905_v52 }
 0x858   :  { %v1755_v55 = vpop.f32.mrf.mxu0 }
 0x859   :  { %1788 = vst [vmem:[#allocation2 + $0x10] sm:$0xff] %v1764_v54  ;;  %v1756_v56 = vadd.f32 %v1905_v52, %v1755_v55 }
 0x85a   :  { %v2207_v57 = vpop.f32.mrf.mxu0 }
 0x85b   :  { %1786 = vst [vmem:[#allocation2] sm:$0xff] %v1756_v56  ;;  %v1767_v58 = vadd.f32 %v2207_v57, %v1905_v52 }
 0x85c   :  { %v1758_v59 = vpop.f32.mrf.mxu0 }
 0x85d   :  { %1789 = vst [vmem:[#allocation2 + $0x18] sm:$0xff] %v1767_v58  ;;  %v1759_v5 = vadd.f32 %v1905_v52, %v1758_v59 }
 0x85e   :  { %v2210_v60 = vpop.f32.mrf.mxu0 }
 0x85f   :  { %1787 = vst [vmem:[#allocation2 + $0x8] sm:$0xff] %v1759_v5  ;;  %v1780_v38 = vadd.f32 %v2210_v60, %v1905_v52 }
 0x860   :  { %v1771_v61 = vpop.f32.mrf.mxu0 }
 0x861   :  { %1792 = vst [vmem:[#allocation2 + $0x30] sm:$0xff] %v1780_v38  ;;  %v1772_v62 = vadd.f32 %v1905_v52, %v1771_v61 }
 0x862   :  { %v2211_v63 = vpop.f32.mrf.mxu0 }
 0x863   :  { %1790 = vst [vmem:[#allocation2 + $0x20] sm:$0xff] %v1772_v62  ;;  %v1783_v0 = vadd.f32 %v2211_v63, %v1905_v52 }
 0x864   :  { %v1774_v7 = vpop.f32.mrf.mxu0 }
 0x865   :  { %1793 = vst [vmem:[#allocation2 + $0x38] sm:$0xff] %v1783_v0  ;;  %v1775_v30 = vadd.f32 %v1905_v52, %v1774_v7 }
 0x867   :  { %1791 = vst [vmem:[#allocation2 + $0x28] sm:$0xff] %v1775_v30 }
 0x868   :  { %2355 = shalt.err (!%p2352_p4)
}
 0x869   :  { %s2370_s19 = smov 128   ;;  %s2371_s20 = smov 8  }
 0x86a   :  { %1805 = dma.vmem_to_hbm [thread:$0]  %s1800_s18, 1024, %s2892_s10, [#allocation3], %s2370_s19, %s2370_s19, %s2371_s20  }
 0x86b   :  { %2364 = dma.done.wait [#allocation3], 1024  }
 0x86c   :  { %2365 = vsyncadd [#allocation3], 4294966272 }
 0x86d   :  { %1809 = vsyncpa [#allocation3], 1 }

</bundles_post_ra>
